<compile_context>
chip_gen: v6e
topology: v6e:2x2x1
jax: 0.10.0
libtpu: 0.0.40
codegen_flags: <defaults>
</compile_context>

<pallas_src>
import functools

import jax
import jax.numpy as jnp
import numpy as np
from jax.experimental import pallas as pl
from jax.experimental.pallas import tpu as pltpu


def _conv2d_kernel(x_ref, w_ref, b_ref, o_ref, xpad_ref, *, KH, KW, P, Ho, Wo):
    """One batch image per grid step.

    x_ref   : (1, Cin, H, W)       input block (NCHW, unpadded)
    w_ref   : (Cout, KH*KW*Cin)    mult-folded weights, tap order (kh, kw, ci)
    b_ref   : (Cout, 1)            mult-folded bias (column vector)
    o_ref   : (1, Cout, Ho*Wo)     lane-dense output block (flattened spatial)
    xpad_ref: (Cin, H+2P, W+2P)    VMEM scratch: zero-padded activation
    """
    Cin, H, W = x_ref.shape[1], x_ref.shape[2], x_ref.shape[3]

    # Zero-pad in VMEM (replaces a separate XLA pad op + HBM round trip).
    # Border zeros are rewritten every step so the scratch is always valid,
    # even when the grid is sharded across TensorCores.
    if P > 0:
        xpad_ref[...] = jnp.zeros(xpad_ref.shape, xpad_ref.dtype)
    xpad_ref[:, P:P + H, P:P + W] = x_ref[0]

    # im2col: stack the KH*KW shifted views along the contraction axis so the
    # whole conv is a single matmul with K = KH*KW*Cin.
    taps = []
    for kh in range(KH):
        for kw in range(KW):
            taps.append(
                xpad_ref[:, kh:kh + Ho, kw:kw + Wo].reshape(Cin, Ho * Wo))
    patches = jnp.concatenate(taps, axis=0)            # (KH*KW*Cin, Ho*Wo)

    # (Cout, K) @ (K, Ho*Wo) -> (Cout, Ho*Wo): lane-dense result, already in
    # NCHW order, f32 accumulation on the MXU.
    acc = jnp.dot(w_ref[...], patches, preferred_element_type=jnp.float32)
    acc = acc + b_ref[...].astype(jnp.float32)         # (Cout, 1) broadcast
    o_ref[0] = acc.astype(o_ref.dtype)


def pallas_conv2d(x_nchw, weight_oihw, bias, *, padding, mult):
    """Replicates: F.conv2d(x, weight, bias=bias, padding=padding) * mult."""
    N, Cin, H, W = x_nchw.shape
    Cout, Cin_w, KH, KW = weight_oihw.shape
    assert Cin == Cin_w
    P = int(padding)
    Ho = H + 2 * P - KH + 1
    Wo = W + 2 * P - KW + 1

    # Fold `mult` into the tiny weight / bias tensors (wrapper-side cost is
    # KH*KW*Cin*Cout + Cout elements ~ free) and flatten the weights to the
    # im2col tap order (kh, kw, ci) used in the kernel.
    w_flat = (jnp.transpose(weight_oihw, (0, 2, 3, 1))
              .reshape(Cout, KH * KW * Cin) * jnp.float32(mult)
              ).astype(jnp.float32)
    b_col = (bias.reshape(Cout, 1) * jnp.float32(mult)).astype(jnp.float32)

    kernel = functools.partial(_conv2d_kernel, KH=KH, KW=KW, P=P, Ho=Ho, Wo=Wo)

    out_flat = pl.pallas_call(
        kernel,
        out_shape=jax.ShapeDtypeStruct((N, Cout, Ho * Wo), x_nchw.dtype),
        grid_spec=pltpu.PrefetchScalarGridSpec(
            num_scalar_prefetch=0,
            grid=(N,),
            in_specs=[
                # one image per grid step
                pl.BlockSpec((1, Cin, H, W), lambda n: (n, 0, 0, 0)),
                # weights / bias: same (whole) block every step
                pl.BlockSpec((Cout, KH * KW * Cin), lambda n: (0, 0)),
                pl.BlockSpec((Cout, 1), lambda n: (0, 0)),
            ],
            out_specs=pl.BlockSpec((1, Cout, Ho * Wo), lambda n: (n, 0, 0)),
            scratch_shapes=[
                pltpu.VMEM((Cin, H + 2 * P, W + 2 * P), x_nchw.dtype),
            ],
        ),
        compiler_params=pltpu.CompilerParams(
            dimension_semantics=("parallel",),      # megacore on v7x
            vmem_limit_bytes=32 * 1024 * 1024,      # safe on v5e/v6e/v7x
        ),
    )(x_nchw, w_flat, b_col)

    # Free metadata reshape: output is already NCHW-ordered.
    return out_flat.reshape(N, Cout, Ho, Wo)


def make_conv2d_params(key, fmaps_in, fmaps_out, kernel_size,
                       bias=True, bias_init=0.0, gain=2.0, use_wscale=False):
    """Deterministic re-implementation of Mini_Container's parameter init."""
    shape = (fmaps_out, fmaps_in, kernel_size, kernel_size)
    fan_in = int(np.prod(shape[1:]))
    std = float(np.sqrt(gain / fan_in))
    # Both branches in Mini_Container draw N(0, 1) weights.
    weight = jax.random.normal(key, shape, dtype=jnp.float32)
    b = jnp.full((fmaps_out,), bias_init, dtype=jnp.float32) if bias \
        else jnp.zeros((fmaps_out,), dtype=jnp.float32)
    mult = std if use_wscale else 1.0
    return weight, b, mult


if __name__ == "__main__":
    key = jax.random.PRNGKey(0)
    k_x, k_w = jax.random.split(key)

    # Small shapes consistent with the module: conv2d(fmaps_in=4, fmaps_out=8, k=3)
    N, Cin, H, W = 2, 4, 16, 16
    Cout, ksize = 8, 3
    padding = ksize // 2          # padding=True branch
    use_wscale = True             # exercises the wscale `mult` path

    x = jax.random.normal(k_x, (N, Cin, H, W), dtype=jnp.float32)
    weight, bias, mult = make_conv2d_params(
        k_w, Cin, Cout, ksize, bias=True, bias_init=0.1, gain=2.0,
        use_wscale=use_wscale,
    )

    out = pallas_conv2d(x, weight, bias, padding=padding, mult=mult)
    out = jax.block_until_ready(out)

    # Cross-check against XLA's reference convolution (same semantics as
    # F.conv2d(x, w, bias=b, padding=p) * mult).
    ref = jax.lax.conv_general_dilated(
        x, weight, window_strides=(1, 1),
        padding=[(padding, padding), (padding, padding)],
        dimension_numbers=("NCHW", "OIHW", "NCHW"),
    )
    ref = (ref + bias.reshape(1, Cout, 1, 1)) * mult

    np.testing.assert_allclose(np.asarray(out), np.asarray(ref),
                               rtol=1e-4, atol=1e-4)
    print("KERNEL_OK")
</pallas_src>

<mosaic_0001>
module attributes {stable_mosaic.version = 11 : i64} {
  func.func @_conv2d_kernel(%arg0: i32, %arg1: memref<1x4x16x16xf32, #tpu.memory_space<vmem>>, %arg2: memref<8x36xf32, #tpu.memory_space<vmem>>, %arg3: memref<8x1xf32, #tpu.memory_space<vmem>>, %arg4: memref<1x8x256xf32, #tpu.memory_space<vmem>>, %arg5: memref<4x18x18xf32, #tpu.memory_space<vmem>>) attributes {dimension_semantics = [#tpu.dimension_semantics<parallel>], iteration_bounds = array<i64: 2>, scalar_prefetch = 0 : i64, scratch_operands = 1 : i64, tpu.core_type = #tpu.core_type<tc>, window_params = [{transform_indices = @transform_0, window_bounds = array<i64: 1, 4, 16, 16>}, {pipeline_mode = #tpu.pipeline_mode<synchronous>, transform_indices = @transform_1, window_bounds = array<i64: 8, 36>}, {pipeline_mode = #tpu.pipeline_mode<synchronous>, transform_indices = @transform_2, window_bounds = array<i64: 8, 1>}, {transform_indices = @transform_3, window_bounds = array<i64: 1, 8, 256>}]} {
    %cst = arith.constant 0.000000e+00 : f32
    %0 = vector.broadcast %cst : f32 to vector<4x18x18xf32>
    %c0 = arith.constant 0 : index
    %c0_0 = arith.constant 0 : index
    %c0_1 = arith.constant 0 : index
    %1 = vector.load %arg5[%c0, %c0_0, %c0_1] : memref<4x18x18xf32, #tpu.memory_space<vmem>>, vector<4x18x18xf32>
    tpu.vector_store %arg5[%c0, %c0_0, %c0_1], %0 {strides = array<i32>} : memref<4x18x18xf32, #tpu.memory_space<vmem>>, vector<4x18x18xf32>,
    %c0_2 = arith.constant 0 : index
    %c0_3 = arith.constant 0 : index
    %c0_4 = arith.constant 0 : index
    %c0_5 = arith.constant 0 : index
    %2 = vector.load %arg1[%c0_2, %c0_3, %c0_4, %c0_5] : memref<1x4x16x16xf32, #tpu.memory_space<vmem>>, vector<1x4x16x16xf32>
    %3 = vector.shape_cast %2 : vector<1x4x16x16xf32> to vector<4x16x16xf32>
    %c0_6 = arith.constant 0 : index
    %c1 = arith.constant 1 : index
    %c1_7 = arith.constant 1 : index
    %4 = vector.load %arg5[%c0_6, %c1, %c1_7] : memref<4x18x18xf32, #tpu.memory_space<vmem>>, vector<4x16x16xf32>
    tpu.vector_store %arg5[%c0_6, %c1, %c1_7], %3 {strides = array<i32>} : memref<4x18x18xf32, #tpu.memory_space<vmem>>, vector<4x16x16xf32>,
    %c0_8 = arith.constant 0 : index
    %c0_9 = arith.constant 0 : index
    %c0_10 = arith.constant 0 : index
    %5 = vector.load %arg5[%c0_8, %c0_9, %c0_10] : memref<4x18x18xf32, #tpu.memory_space<vmem>>, vector<4x16x16xf32>
    %6 = vector.shape_cast %5 : vector<4x16x16xf32> to vector<4x256xf32>
    %c0_11 = arith.constant 0 : index
    %c0_12 = arith.constant 0 : index
    %c1_13 = arith.constant 1 : index
    %7 = vector.load %arg5[%c0_11, %c0_12, %c1_13] : memref<4x18x18xf32, #tpu.memory_space<vmem>>, vector<4x16x16xf32>
    %8 = vector.shape_cast %7 : vector<4x16x16xf32> to vector<4x256xf32>
    %c0_14 = arith.constant 0 : index
    %c0_15 = arith.constant 0 : index
    %c2 = arith.constant 2 : index
    %9 = vector.load %arg5[%c0_14, %c0_15, %c2] : memref<4x18x18xf32, #tpu.memory_space<vmem>>, vector<4x16x16xf32>
    %10 = vector.shape_cast %9 : vector<4x16x16xf32> to vector<4x256xf32>
    %c0_16 = arith.constant 0 : index
    %c1_17 = arith.constant 1 : index
    %c0_18 = arith.constant 0 : index
    %11 = vector.load %arg5[%c0_16, %c1_17, %c0_18] : memref<4x18x18xf32, #tpu.memory_space<vmem>>, vector<4x16x16xf32>
    %12 = vector.shape_cast %11 : vector<4x16x16xf32> to vector<4x256xf32>
    %c0_19 = arith.constant 0 : index
    %c1_20 = arith.constant 1 : index
    %c1_21 = arith.constant 1 : index
    %13 = vector.load %arg5[%c0_19, %c1_20, %c1_21] : memref<4x18x18xf32, #tpu.memory_space<vmem>>, vector<4x16x16xf32>
    %14 = vector.shape_cast %13 : vector<4x16x16xf32> to vector<4x256xf32>
    %c0_22 = arith.constant 0 : index
    %c1_23 = arith.constant 1 : index
    %c2_24 = arith.constant 2 : index
    %15 = vector.load %arg5[%c0_22, %c1_23, %c2_24] : memref<4x18x18xf32, #tpu.memory_space<vmem>>, vector<4x16x16xf32>
    %16 = vector.shape_cast %15 : vector<4x16x16xf32> to vector<4x256xf32>
    %c0_25 = arith.constant 0 : index
    %c2_26 = arith.constant 2 : index
    %c0_27 = arith.constant 0 : index
    %17 = vector.load %arg5[%c0_25, %c2_26, %c0_27] : memref<4x18x18xf32, #tpu.memory_space<vmem>>, vector<4x16x16xf32>
    %18 = vector.shape_cast %17 : vector<4x16x16xf32> to vector<4x256xf32>
    %c0_28 = arith.constant 0 : index
    %c2_29 = arith.constant 2 : index
    %c1_30 = arith.constant 1 : index
    %19 = vector.load %arg5[%c0_28, %c2_29, %c1_30] : memref<4x18x18xf32, #tpu.memory_space<vmem>>, vector<4x16x16xf32>
    %20 = vector.shape_cast %19 : vector<4x16x16xf32> to vector<4x256xf32>
    %c0_31 = arith.constant 0 : index
    %c2_32 = arith.constant 2 : index
    %c2_33 = arith.constant 2 : index
    %21 = vector.load %arg5[%c0_31, %c2_32, %c2_33] : memref<4x18x18xf32, #tpu.memory_space<vmem>>, vector<4x16x16xf32>
    %22 = vector.shape_cast %21 : vector<4x16x16xf32> to vector<4x256xf32>
    %23 = tpu.concatenate %6, %8, %10, %12, %14, %16, %18, %20, %22 in 0 : vector<4x256xf32>, vector<4x256xf32>, vector<4x256xf32>, vector<4x256xf32>, vector<4x256xf32>, vector<4x256xf32>, vector<4x256xf32>, vector<4x256xf32>, vector<4x256xf32> -> vector<36x256xf32>
    %c0_34 = arith.constant 0 : index
    %c0_35 = arith.constant 0 : index
    %24 = vector.load %arg2[%c0_34, %c0_35] : memref<8x36xf32, #tpu.memory_space<vmem>>, vector<8x36xf32>
    %cst_36 = arith.constant dense<0.000000e+00> : vector<8x256xf32>
    %25 = tpu.matmul %24, %23, %cst_36 {dimension_numbers = #tpu.dot_dimension_numbers<[1], [0], [0], [1], [0, 0, 1, 1], [], []>} : vector<8x36xf32>, vector<36x256xf32>, vector<8x256xf32> -> vector<8x256xf32>
    %c0_37 = arith.constant 0 : index
    %c0_38 = arith.constant 0 : index
    %26 = vector.load %arg3[%c0_37, %c0_38] : memref<8x1xf32, #tpu.memory_space<vmem>>, vector<8x1xf32>
    %27 = vector.broadcast %26 : vector<8x1xf32> to vector<8x256xf32>
    %28 = arith.addf %25, %27 : vector<8x256xf32>
    %c0_39 = arith.constant 0 : index
    %c0_40 = arith.constant 0 : index
    %c0_41 = arith.constant 0 : index
    %29 = vector.load %arg4[%c0_39, %c0_40, %c0_41] : memref<1x8x256xf32, #tpu.memory_space<vmem>>, vector<1x8x256xf32>
    %30 = vector.shape_cast %29 : vector<1x8x256xf32> to vector<8x256xf32>
    %31 = vector.shape_cast %28 : vector<8x256xf32> to vector<1x8x256xf32>
    tpu.vector_store %arg4[%c0_39, %c0_40, %c0_41], %31 {strides = array<i32>} : memref<1x8x256xf32, #tpu.memory_space<vmem>>, vector<1x8x256xf32>,
    return
  }
  func.func @transform_0(%arg0: i32) -> (i32, i32, i32, i32) {
    %c0_i32 = arith.constant 0 : i32
    %c0_i32_0 = arith.constant 0 : i32
    %c0_i32_1 = arith.constant 0 : i32
    %c0_i32_2 = arith.constant 0 : i32
    return %arg0, %c0_i32, %c0_i32_0, %c0_i32_1 : i32, i32, i32, i32
  }
  func.func @transform_1(%arg0: i32) -> (i32, i32) {
    %c0_i32 = arith.constant 0 : i32
    %c0_i32_0 = arith.constant 0 : i32
    %c0_i32_1 = arith.constant 0 : i32
    return %c0_i32, %c0_i32_0 : i32, i32
  }
  func.func @transform_2(%arg0: i32) -> (i32, i32) {
    %c0_i32 = arith.constant 0 : i32
    %c0_i32_0 = arith.constant 0 : i32
    %c0_i32_1 = arith.constant 0 : i32
    return %c0_i32, %c0_i32_0 : i32, i32
  }
  func.func @transform_3(%arg0: i32) -> (i32, i32, i32) {
    %c0_i32 = arith.constant 0 : i32
    %c0_i32_0 = arith.constant 0 : i32
    %c0_i32_1 = arith.constant 0 : i32
    return %arg0, %c0_i32, %c0_i32_0 : i32, i32, i32
  }
}

</mosaic_0001>

<bundles_post_ra>
// kernel: tpu_custom_call.1
= control target key start
LH: loop header
LB: loop body
LE: loop exit
PB: predicated region body
PF: predicated region fallthrough
CT: control target
= control target key end

     0   :  { %8 = vsyncpa [#allocation4], 0  ;;  %s4421_s0 = inlined_call_operand.hbm [shape: f32[2,4,16,16], index: 0, kind: input, shape index: {}]   ;;  %s4422_s1 = inlined_call_operand.vmem [shape: f32[8,36], index: 1, kind: input, shape index: {}]   ;;  %s4423_s2 = inlined_call_operand.vmem [shape: f32[8,1], index: 2, kind: input, shape index: {}]   ;;  %s4424_s3 = inlined_call_operand.hbm [shape: f32[2,8,256], index: 3, kind: output, shape index: {}]  }
   0x1   :  { %10 = vsyncpa [#allocation4 + $0x1], 0 }
   0x2   :  { %11 = vsyncpa [#allocation5], 0 }
   0x3   :  { %13 = vsyncpa [#allocation5 + $0x1], 0  ;;  %s2749_s12 = smov 0   ;;  %s2751_s13 = smov 0  }
   0x4   :  { %s2753_s14 = smov 0   ;;  %s2755_s15 = smov 0  }
   0x5 LB: > { %s2770_s16 = sadd.s32 4294967295, %s2709_s15   ;;  %s2513_s17 = sadd.s32 4294967294, %s2709_s15   ;;  %s2709_s15 = sphi %s2755_s15, %s4580_s15   ;;  %s2705_s14 = sphi %s2753_s14, %s4579_s14   ;;  %s2701_s13 = sphi %s2751_s13, %s4578_s13   ;;  %s2697_s12 = sphi %s2749_s12, %s4577_s12  }
   0x6   : > { %s2774_s18 = sadd.s32 1, %s2709_s15   ;;  %s26_s19 = sadd.s32 1, %s2705_s14 }
   0x7   : > { %s23_s20 = ssub.s32 %s2709_s15, %s2774_s18  ;;  %p33_p0 = scmp.ne.s32.totalorder %s2705_s14, %s2701_s13 }
   0x8   : > { %p24_p1 = scmp.eq.s32.totalorder %s23_s20, 0  ;;  %p34_p2 = scmp.eq.s32.totalorder %s2709_s15, 0 }
   0x9   : > { %p39_p3 = scmp.ne.s32.totalorder %s2701_s13, %s2697_s12  ;;  %p40_p4 = scmp.eq.s32.totalorder %s2770_s16, 0 }
   0xa   : > { %s2786_s21 = scalar_select %p24_p1, %s2705_s14, %s26_s19  }
   0xb   : > { %p2788_p5 = por %p34_p2, %p33_p0  ;;  %p2792_p6 = por %p40_p4, %p39_p3 }
   0xc   : > { %p105_p7 = scmp.eq.s32.totalorder %s2770_s16, 1  ;;  %p111_p8 = scmp.eq.s32.totalorder %s2513_s17, 1 }
   0xd   : > { %s4461_s23 = scalar_select %p2792_p6, 1, 0 }
   0xe   : > { %p2544_p10 = scmp.lt.s32.totalorder %s2709_s15, 2  ;;  %p2799_p11 = por %p105_p7, %p33_p0 }
   0xf   : > { %p2803_p12 = por %p111_p8, %p39_p3  ;;  %s137_s26 = sand.u32 1, %s2705_s14  }
  0x10   : > { %s4462_s24 = scalar_select %p2799_p11, 1, 0 }
  0x11   : > { %s4463_s25 = scalar_select %p2803_p12, 1, 0 }
  0x12   : > { %s2530_s27 = sshll.u32 %s2709_s15, 10  ;;  %s2516_s28 = sshll.u32 %s137_s26, 6 }
  0x13   : > { %s2812_s4 = scalar_lea.hbm %s4421_s0, %s2530_s27  ;;  %s141_s5 = scalar_lea.vmem [#allocation3], %s2516_s28 }
  0x14   : > { %s148_s6 = sshll.u32 %s141_s5, 4  ;;  %p2816_p13 = pnand %p2544_p10, %p2788_p5  ;;  %s2820_s6 = int_to_ptr.vmem [resolvable:$true] %s148_s6 }
  0x15   : > { %s2822_s8 = scalar_lea.sflag [#allocation4], %s137_s26  ;;  %s2617_s9 = scalar_lea.hbm %s2812_s4, 1024 }
  0x16   : > { %p2618_p0 = scmp.ne.s32.totalorder %s2812_s4, %s2617_s9  ;;  %p2619_p1 = pneg %p2816_p13 }
  0x17   : > { %s2622_s17 = scalar_lea.hbm %s4421_s0, 2048  ;;  %p2623_p4 = scmp.lt.s32.totalorder %s2812_s4, %s4421_s0 }
  0x18   : > { %p2620_p2 = pnand %p2619_p1, %p2618_p0  ;;  %p2624_p5 = scmp.lt.s32.totalorder %s2622_s17, %s2617_s9 }
  0x1a   : > { %p2621_p3 = pneg %p2620_p2  ;;  %p2625_p7 = por %p2624_p5, %p2623_p4 }
  0x1c   : > { %p2626_p8 = pnand %p2625_p7, %p2621_p3 }
  0x1e   : > { %2629 = shalt.err (!%p2626_p8)
}
  0x1f   : > { %s2630_s22 = scalar_lea.vmem %s2820_s6, 1024  ;;  %s2711_s26 = smov [#allocation3]  }
  0x20   : > { %p2631_p10 = scmp.ne.s32.totalorder %s2820_s6, %s2630_s22  ;;  %s2635_s27 = sshll.u32 %s2711_s26, 4  ;;  %s2636_s27 = int_to_ptr.vmem [resolvable:$false] %s2635_s27 }
  0x21   : > { %s2637_s28 = scalar_lea.vmem %s2636_s27, 2048  ;;  %p2638_p2 = scmp.lt.s32.totalorder %s2820_s6, %s2636_s27 }
  0x22   : > { %p2633_p9 = pnand %p2631_p10, %p2619_p1  ;;  %p2639_p12 = scmp.lt.s32.totalorder %s2637_s28, %s2630_s22 }
  0x24   : > { %p2634_p0 = pneg %p2633_p9  ;;  %p2640_p11 = por %p2639_p12, %p2638_p2 }
  0x26   : > { %p2641_p6 = pnand %p2640_p11, %p2634_p0 }
  0x28   : > { %2644 = shalt.err (!%p2641_p6)
}
  0x29   : > { %s2712_s29 = smov 128   ;;  %s2713_s30 = smov 8  }
  0x2a   : > { %2539 = dma.hbm_to_vmem [thread:$0]  (!%p2816_p13), %s2812_s4, 1024, %s2820_s6, %s2822_s8, %s2712_s29, %s2712_s29, %s2713_s30  }
  0x2b   : > { %p2519_p9 = scmp.ge.s32.totalorder %s2709_s15, 1  ;;  %p156_p1 = scmp.lt.s32.totalorder %s2709_s15, 3 }
  0x2d   : > { %p157_p3 = pnand %p2519_p9, %p156_p1 }
  0x2f   : > { %160 = sbr.rel (%p157_p3) target bundleno = 877 (0x36d), region = 32 }
  0x34   : > { %s2846_s5 = sand.u32 1, %s2701_s13   ;;  %p4465_p6 = scmp.ne.s32.totalorder %s4461_s23, 0 }
  0x35   : > { %s2520_s9 = sshll.u32 %s2846_s5, 6  ;;  %s163_s10 = scalar_lea.sflag [#allocation4], %s2846_s5 }
  0x36   : > { %s2850_s11 = scalar_lea.vmem [#allocation3], %s2520_s9 }
  0x37   : > { %2688 = dma.done.wait (%p4465_p6), %s163_s10, 1024  }
  0x38   : > { %2690 = vsyncadd (%p4465_p6), %s163_s10, 4294966272  ;;  %vm189_vm0 = vcmask 146432   ;;  %vm192_vm1 = vcmask 140288   ;;  %v4427_v0 = vmov 0.0   ;;  %v208_v1 = vld [vmem:[%s2850_s11 + $0x28] sm:$0xff]  ;;  %s2715_s23 = smov 1   ;;  %v265_v13 = vlaneseq }
  0x39   : > { %198 = vst.msk [vmem:[#allocation2 + $0x38] sm:$0xff] %vm189_vm0, %v4427_v0  ;;  %190 = vst.msk [vmem:[#allocation2] sm:$0xff] %vm189_vm0, %v4427_v0  ;;  %2419 = vmatprep.mubr.f32.mxu0 %v4427_v0  ;;  %v204_v2 = vld [vmem:[%s2850_s11 + $0x8] sm:$0xff]  ;;  %229 = vrot.lane.b32.xlu1 %v208_v1, %s2715_s23  ;;  %v210_v3 = vld [vmem:[%s2850_s11 + $0x38] sm:$0xff]  ;;  %vm243_vm2 = vcmask 138248   ;;  %s2717_s4 = smov 127  }
  0x3a   : > { %199 = vst.msk [vmem:[#allocation2 + $0x40] sm:$0x3] %vm192_vm1, %v4427_v0  ;;  %193 = vst.msk [vmem:[#allocation2 + $0x10] sm:$0x3] %vm192_vm1, %v4427_v0  ;;  %221 = vrot.lane.b32.xlu0 %v204_v2, %s2715_s23  ;;  %v206_v4 = vld [vmem:[%s2850_s11 + $0x18] sm:$0xff]  ;;  %v205_v5 = vld [vmem:[%s2850_s11 + $0x10] sm:$0xff] }
  0x3b   : > { %191 = vst.msk [vmem:[#allocation2 + $0x8] sm:$0xff] %vm189_vm0, %v4427_v0  ;;  %194 = vst.msk [vmem:[#allocation2 + $0x18] sm:$0xff] %vm189_vm0, %v4427_v0  ;;  %v203_v6 = vld [vmem:[%s2850_s11] sm:$0xff]  ;;  %v209_v7 = vld [vmem:[%s2850_s11 + $0x30] sm:$0xff]  ;;  %v2716_v11 = vmov 1983009808  }
  0x3c   : > { %195 = vst.msk [vmem:[#allocation2 + $0x20] sm:$0xff] %vm189_vm0, %v4427_v0  ;;  %197 = vst.msk [vmem:[#allocation2 + $0x30] sm:$0xff] %vm189_vm0, %v4427_v0  ;;  %v207_v8 = vld [vmem:[%s2850_s11 + $0x20] sm:$0xff]  ;;  %v263_v12 = vunpack.c.l.s4 %v2716_v11  ;;  %v2881_v17 = vshrl.u32 %v265_v13, 7  ;;  %s2718_s6 = smov 126   ;;  %s2720_s7 = smov 32  }
  0x3d   : > { %196 = vst.msk [vmem:[#allocation2 + $0x28] sm:$0x3] %vm192_vm1, %v4427_v0  ;;  %202 = vst.msk [vmem:[#allocation2 + $0x58] sm:$0x3] %vm192_vm1, %v4427_v0  ;;  %233 = vrot.lane.b32.xlu1 %v210_v3, %s2715_s23  ;;  %s2721_s8 = smov 64   ;;  %s2722_s17 = smov 16  }
  0x3e   : > { %200 = vst.msk [vmem:[#allocation2 + $0x48] sm:$0xff] %vm189_vm0, %v4427_v0  ;;  %201 = vst.msk [vmem:[#allocation2 + $0x50] sm:$0xff] %vm189_vm0, %v4427_v0  ;;  %225 = vrot.lane.b32.xlu0 %v206_v4, %s2715_s23  ;;  %v264_v16 = vunpack.c.0.s8 %v263_v12  ;;  %s2723_s19 = smov 48   ;;  %s2724_s20 = smov 80   ;;  %vm452_vm3 = vcmask 130048   ;;  %vm454_vm4 = vcmask 261120  }
  0x3f   : > { %s2725_s22 = smov 96   ;;  %s2726_s26 = smov 112   ;;  %vm456_vm5 = vcmask 392192   ;;  %vm458_vm6 = vcmask 523264   ;;  %vm460_vm7 = vcmask 654336   ;;  %vm462_vm8 = vcmask 785408  }
  0x40   : > { %v2904_v28 = vsub.s32 %v264_v16, %v2881_v17  ;;  %vm2329_vm9 = vcmask 1043456   ;;  %vm464_vm10 = vcmask 916480   ;;  %vm2345_vm11 = vcmask 293888   ;;  %s2521_s9 = sshll.u32 %s2846_s5, 4  ;;  %s2531_s10 = sshll.u32 %s2770_s16, 8 }
  0x41   : > { %223 = vrot.lane.b32.xlu1 %v205_v5, %s2715_s23  ;;  %s188_s11 = scalar_lea.vmem [#allocation6], %s2521_s9  ;;  %p4574_p12 = scmp.ne.s32.totalorder %s4462_s24, 0 }
  0x42   : > { %219 = vrot.lane.b32.xlu0 %v203_v6, %s2715_s23 }
  0x45   : > { %231 = vrot.lane.b32.xlu1 %v209_v7, %s2715_s23 }
  0x46   : > { %227 = vrot.lane.b32.xlu0 %v207_v8, %s2715_s23  ;;  %s2443_s23 = sshll.u32 %s188_s11, 4  ;;  %s2444_s23 = int_to_ptr.vmem [resolvable:$true] %s2443_s23 }
  0xab   : > { %v230_v9 = vpop.permute.xlu1 %229 }
  0xac   : > { %v222_v10 = vpop.permute.xlu0 %221  ;;  %249 = vst.msk [vmem:[#allocation2 + $0x39] sm:$0xff] %vm243_vm2, %v230_v9 }
  0xad   : > { %245 = vst.msk [vmem:[#allocation2 + $0x9] sm:$0xff] %vm243_vm2, %v222_v10 }
  0xaf   : > { %v234_v14 = vpop.permute.xlu1 %233 }
  0xb0   : > { %v226_v15 = vpop.permute.xlu0 %225  ;;  %251 = vst.msk [vmem:[#allocation2 + $0x51] sm:$0xff] %vm243_vm2, %v234_v14 }
  0xb1   : > { %247 = vst.msk [vmem:[#allocation2 + $0x21] sm:$0xff] %vm243_vm2, %v226_v15 }
  0xb3   : > { %v224_v18 = vpop.permute.xlu1 %223  ;;  %v2885_v21 = vld [vmem:[#allocation2 + $0x3a] sm:$0xff] }
  0xb4   : > { %v220_v19 = vpop.permute.xlu0 %219  ;;  %v2883_v20 = vld [vmem:[#allocation2 + $0xa] sm:$0xff]  ;;  %246 = vst.msk [vmem:[#allocation2 + $0x19] sm:$0xff] %vm243_vm2, %v224_v18  ;;  %v2897_v25 = vld [vmem:[#allocation2 + $0x39] sm:$0xff] }
  0xb5   : > { %v2887_v22 = vld [vmem:[#allocation2 + $0x9] sm:$0xff]  ;;  %244 = vst.msk [vmem:[#allocation2 + $0x1] sm:$0xff] %vm243_vm2, %v220_v19  ;;  %1847 = vrot.lane.b32.xlu1 %v2883_v20, %s2717_s4  ;;  %v1699_v23 = vcombine.low %v2883_v20, %v2885_v21  ;;  %v1700_v24 = vcombine.high %v2883_v20, %v2885_v21 }
  0xb6   : > { %v1017_v26 = vcombine.low %v2887_v22, %v2897_v25  ;;  %v1018_v27 = vcombine.high %v2887_v22, %v2897_v25 }
  0xb7   : > { %v232_v29 = vpop.permute.xlu1 %231  ;;  %v2906_v32 = vld [vmem:[#allocation2 + $0x52] sm:$0xff]  ;;  %v2924_v39 = vrot.slane %v1699_v23, %v2904_v28  ;;  %v2930_v41 = vrot.slane %v1700_v24, %v2904_v28 }
  0xb8   : > { %v228_v30 = vpop.permute.xlu0 %227  ;;  %v1626_v31 = vld [vmem:[#allocation2 + $0x22] sm:$0xff]  ;;  %250 = vst.msk [vmem:[#allocation2 + $0x49] sm:$0xff] %vm243_vm2, %v232_v29  ;;  %v2917_v36 = vld [vmem:[#allocation2 + $0x51] sm:$0xff]  ;;  %v2938_v44 = vrot.slane %v1017_v26, %v2904_v28  ;;  %v2944_v46 = vrot.slane %v1018_v27, %v2904_v28 }
  0xb9   : > { %v2908_v33 = vld [vmem:[#allocation2 + $0x21] sm:$0xff]  ;;  %248 = vst.msk [vmem:[#allocation2 + $0x31] sm:$0xff] %vm243_vm2, %v228_v30  ;;  %1851 = vrot.lane.b32.xlu0 %v1626_v31, %s2717_s4  ;;  %1855 = vrot.lane.b32.xlu1 %v2885_v21, %s2717_s4  ;;  %v1715_v34 = vcombine.low %v1626_v31, %v2906_v32  ;;  %v1716_v35 = vcombine.high %v1626_v31, %v2906_v32 }
  0xba   : > { %v1033_v37 = vcombine.low %v2908_v33, %v2917_v36  ;;  %v1034_v38 = vcombine.high %v2908_v33, %v2917_v36  ;;  %4466 = vst [vmem:[#allocation9_spill] sm:$0xff] %v2944_v46 }
  0xbb   : > { %v2927_v40 = vrot.slane %v1715_v34, %v2904_v28  ;;  %v2933_v42 = vrot.slane %v1716_v35, %v2904_v28  ;;  %v2967_v55 = vld [vmem:[#allocation2 + $0x1a] sm:$0xff] }
  0xbc   : > { %v2935_v43 = vld [vmem:[#allocation2 + $0x2] sm:$0xff]  ;;  %v2941_v45 = vrot.slane %v1033_v37, %v2904_v28  ;;  %v2947_v47 = vrot.slane %v1034_v38, %v2904_v28  ;;  %v2971_v57 = vld [vmem:[#allocation2 + $0x19] sm:$0xff] }
  0xbd   : > { %1859 = vrot.lane.b32.xlu0 %v2906_v32, %s2717_s4  ;;  %1845 = vrot.lane.b32.xlu1 %v2935_v43, %s2717_s4  ;;  %v1732_v48 = vcombine.high %v2924_v39, %v2927_v40  ;;  %v1747_v49 = vcombine.low %v2930_v41, %v2933_v42  ;;  %v1731_v50 = vcombine.low %v2924_v39, %v2927_v40  ;;  %v2969_v56 = vld [vmem:[#allocation2 + $0x1] sm:$0xff]  ;;  %v3021_v24 = vld [vmem:[#allocation2 + $0x18] sm:$0xff] }
  0xbe   : > { %4467 = vst [vmem:[#allocation10_spill] sm:$0xff] %v2947_v47  ;;  %v1050_v51 = vcombine.high %v2938_v44, %v2941_v45  ;;  %v1049_v52 = vcombine.low %v2938_v44, %v2941_v45  ;;  %v1065_v53 = vcombine.low %v2944_v46, %v2947_v47  ;;  %v1748_v54 = vcombine.high %v2930_v41, %v2933_v42  ;;  %v2990_v6 = vld [vmem:[#allocation2 + $0x8] sm:$0xff]  ;;  %v255_v13 = vld [vmem:[#allocation2 + $0x20] sm:$0xff] }
  0xbf   : > { %v1629_v60 = vld [vmem:[#allocation2 + $0x4a] sm:$0xff]  ;;  %v3014_v19 = vld [vmem:[#allocation2] sm:$0xff] }
  0xc0   : > { %v1627_v59 = vld [vmem:[#allocation2 + $0x32] sm:$0xff]  ;;  %v1647_v1 = vcombine.low %v2967_v55, %v1629_v60  ;;  %v2983_v2 = vld [vmem:[#allocation2 + $0x49] sm:$0xff]  ;;  %v1648_v4 = vcombine.high %v2967_v55, %v1629_v60 }
  0xc1   : > { %v2975_v61 = vld [vmem:[#allocation2 + $0x31] sm:$0xff]  ;;  %1849 = vrot.lane.b32.xlu0 %v2967_v55, %s2717_s4  ;;  %1853 = vrot.lane.b32.xlu1 %v1627_v59, %s2717_s4  ;;  %v1631_v62 = vcombine.low %v2935_v43, %v1627_v59  ;;  %v1632_v63 = vcombine.high %v2935_v43, %v1627_v59  ;;  %v966_v7 = vcombine.high %v2971_v57, %v2983_v2  ;;  %v3023_v26 = vld [vmem:[#allocation2 + $0x48] sm:$0xff] }
  0xc2   : > { %v2985_v3 = vld [vmem:[#allocation2 + $0x38] sm:$0xff]  ;;  %v950_v5 = vcombine.high %v2969_v56, %v2975_v61  ;;  %v259_v10 = vld [vmem:[#allocation2 + $0x50] sm:$0xff]  ;;  %v3005_v12 = vrot.slane %v1647_v1, %v2904_v28  ;;  %v277_v35 = vcombine.high %v3021_v24, %v3023_v26  ;;  %v3052_v37 = vrot.slane %v1648_v4, %v2904_v28 }
  0xc3   : > { %v328_v8 = vcombine.low %v2990_v6, %v2985_v3  ;;  %v329_v9 = vcombine.high %v2990_v6, %v2985_v3  ;;  %v3002_v11 = vrot.slane %v1631_v62, %v2904_v28  ;;  %v344_v14 = vcombine.low %v255_v13, %v259_v10 }
  0xc4   : > { %v345_v18 = vcombine.high %v255_v13, %v259_v10  ;;  %v3019_v23 = vrot.slane %v950_v5, %v2904_v28  ;;  %4471 = vst [vmem:[#allocation14_spill] sm:$0xff] %v3052_v37 }
  0xc5   : > { %1857 = vrot.lane.b32.xlu0 %v1629_v60, %s2717_s4  ;;  %2077 = vrot.lane.b32.xlu1 %v2883_v20, %s2718_s6  ;;  %v1664_v15 = vcombine.high %v3002_v11, %v3005_v12  ;;  %v1663_v16 = vcombine.low %v3002_v11, %v3005_v12  ;;  %v3016_v20 = vld [vmem:[#allocation2 + $0x30] sm:$0xff]  ;;  %v3033_v27 = vrot.slane %v328_v8, %v2904_v28 }
  0xc6   : > { %v3036_v29 = vrot.slane %v344_v14, %v2904_v28  ;;  %v261_v30 = vcombine.high %v3014_v19, %v3016_v20  ;;  %v3047_v34 = vrot.slane %v345_v18, %v2904_v28  ;;  %v3074_v8 = vrot.slane %v277_v35, %v2904_v28 }
  0xc8   : > { %4470 = vst [vmem:[#allocation13_spill] sm:$0xff] %v3047_v34  ;;  %4473 = vst [vmem:[#allocation16_spill] sm:$0xff] %v3074_v8 }
  0xc9   : > { %2081 = vrot.lane.b32.xlu0 %v1626_v31, %s2718_s6  ;;  %2085 = vrot.lane.b32.xlu1 %v2885_v21, %s2718_s6  ;;  %v3030_v21 = vrot.slane %v966_v7, %v2904_v28  ;;  %v3041_v31 = vrot.slane %v1632_v63, %v2904_v28  ;;  %v3071_v7 = vrot.slane %v261_v30, %v2904_v28 }
  0xcb   : > { %4468 = vst [vmem:[#allocation11_spill] sm:$0xff] %v3041_v31  ;;  %v1679_v38 = vcombine.low %v3041_v31, %v3052_v37  ;;  %4472 = vst [vmem:[#allocation15_spill] sm:$0xff] %v3071_v7 }
  0xcd   : > { %2089 = vrot.lane.b32.xlu0 %v2906_v32, %s2718_s6  ;;  %1395 = vrot.lane.b32.xlu1 %v2887_v22, %s2718_s6  ;;  %v3044_v32 = vrot.slane %v329_v9, %v2904_v28 }
  0xcf   : > { %4469 = vst [vmem:[#allocation12_spill] sm:$0xff] %v3044_v32 }
  0xd1   : > { %1399 = vrot.lane.b32.xlu0 %v2908_v33, %s2718_s6  ;;  %1403 = vrot.lane.b32.xlu1 %v2897_v25, %s2718_s6 }
  0xd5   : > { %1407 = vrot.lane.b32.xlu0 %v2917_v36, %s2718_s6  ;;  %2075 = vrot.lane.b32.xlu1 %v2935_v43, %s2718_s6 }
  0xd9   : > { %2079 = vrot.lane.b32.xlu0 %v2967_v55, %s2718_s6  ;;  %2083 = vrot.lane.b32.xlu1 %v1627_v59, %s2718_s6 }
  0xdd   : > { %2087 = vrot.lane.b32.xlu0 %v1629_v60, %s2718_s6  ;;  %1393 = vrot.lane.b32.xlu1 %v2969_v56, %s2718_s6 }
  0xe1   : > { %1397 = vrot.lane.b32.xlu0 %v2971_v57, %s2718_s6  ;;  %1401 = vrot.lane.b32.xlu1 %v2975_v61, %s2718_s6 }
  0xe5   : > { %1405 = vrot.lane.b32.xlu0 %v2983_v2, %s2718_s6  ;;  %1165 = vrot.lane.b32.xlu1 %v2887_v22, %s2717_s4  ;;  %v260_v22 = vcombine.low %v3014_v19, %v3016_v20 }
  0xe7   : > { %v268_v43 = vrot.slane %v260_v22, %v2904_v28 }
  0xe9   : > { %1169 = vrot.lane.b32.xlu0 %v2908_v33, %s2717_s4  ;;  %1173 = vrot.lane.b32.xlu1 %v2897_v25, %s2717_s4  ;;  %v276_v25 = vcombine.low %v3021_v24, %v3023_v26  ;;  %v2719_v33 = vmov 1934713408  }
  0xeb   : > { %v284_v55 = vrot.slane %v276_v25, %v2904_v28 }
  0xed   : > { %1177 = vrot.lane.b32.xlu0 %v2917_v36, %s2717_s4  ;;  %1163 = vrot.lane.b32.xlu1 %v2969_v56, %s2717_s4  ;;  %v295_v36 = vunpack.c.l.s4 %v2719_v33  ;;  %v293_v60 = vcombine.high %v268_v43, %v284_v55 }
  0xef   : > { %v296_v59 = vunpack.c.0.s8 %v295_v36 }
  0xf1   : > { %1167 = vrot.lane.b32.xlu0 %v2971_v57, %s2717_s4  ;;  %1171 = vrot.lane.b32.xlu1 %v2975_v61, %s2717_s4 }
  0xf5   : > { %1175 = vrot.lane.b32.xlu0 %v2983_v2, %s2717_s4  ;;  %483 = vrot.lane.b32.xlu1 %v2990_v6, %s2717_s4 }
  0xf9   : > { %487 = vrot.lane.b32.xlu0 %v255_v13, %s2717_s4  ;;  %491 = vrot.lane.b32.xlu1 %v2985_v3, %s2717_s4 }
  0xfd   : > { %495 = vrot.lane.b32.xlu0 %v259_v10, %s2717_s4  ;;  %713 = vrot.lane.b32.xlu1 %v2990_v6, %s2718_s6  ;;  %v949_v6 = vcombine.low %v2969_v56, %v2975_v61 }
 0x101   : > { %717 = vrot.lane.b32.xlu0 %v255_v13, %s2718_s6  ;;  %721 = vrot.lane.b32.xlu1 %v2985_v3, %s2718_s6  ;;  %v3147_v3 = vsub.s32 %v296_v59, %v2881_v17 }
 0x103   : > { %v307_v13 = vrot.slane %v293_v60, %v3147_v3  ;;  %v1746_v17 = vrot.slane %v1732_v48, %v3147_v3  ;;  %v1678_v48 = vrot.slane %v1664_v15, %v3147_v3  ;;  %v3202_v11 = vrot.slane %v1049_v52, %v3147_v3 }
 0x105   : > { %725 = vrot.lane.b32.xlu0 %v259_v10, %s2718_s6  ;;  %481 = vrot.lane.b32.xlu1 %v3014_v19, %s2717_s4  ;;  %v965_v10 = vcombine.low %v2971_v57, %v2983_v2  ;;  %v957_v57 = vrot.slane %v949_v6, %v2904_v28  ;;  %v1064_v2 = vrot.slane %v1050_v51, %v3147_v3 }
 0x106   : > { %v3187_v51 = vrot.slane %v1663_v16, %v3147_v3  ;;  %4476 = vst [vmem:[#allocation19_spill] sm:$0xff] %v3202_v11  ;;  %v1081_v22 = vcombine.high %v3202_v11, %v4427_v0  ;;  %v325_v25 = vcombine.high %v307_v13, %v4427_v0  ;;  %v1696_v60 = vcombine.high %v1678_v48, %v4427_v0 }
 0x107   : > { %v973_v61 = vrot.slane %v965_v10, %v2904_v28  ;;  %v1687_v10 = vrot.slane %v1679_v38, %v3147_v3 }
 0x108   : > { %4474 = vst [vmem:[#allocation17_spill] sm:$0xff] %v3187_v51  ;;  %v1695_v35 = vcombine.high %v3187_v51, %v4427_v0 }
 0x109   : > { %485 = vrot.lane.b32.xlu0 %v3021_v24, %s2717_s4  ;;  %489 = vrot.lane.b32.xlu1 %v3016_v20, %s2717_s4  ;;  %v981_v12 = vcombine.low %v957_v57, %v973_v61 }
 0x10b   : > { %v3212_v33 = vrot.slane %v981_v12, %v3147_v3 }
 0x10d   : > { %493 = vrot.lane.b32.xlu0 %v3023_v26, %s2717_s4  ;;  %711 = vrot.lane.b32.xlu1 %v3014_v19, %s2718_s6  ;;  %v308_v19 = vcombine.low %v3071_v7, %v3074_v8  ;;  %4477 = vst [vmem:[#allocation20_spill] sm:$0xff] %v3212_v33  ;;  %v1013_v52 = vcombine.high %v3212_v33, %v4427_v0 }
 0x10f   : > { %v316_v56 = vrot.slane %v308_v19, %v3147_v3 }
 0x111   : > { %715 = vrot.lane.b32.xlu0 %v3021_v24, %s2718_s6  ;;  %719 = vrot.lane.b32.xlu1 %v3016_v20, %s2718_s6  ;;  %v982_v20 = vcombine.high %v957_v57, %v973_v61  ;;  %v292_v24 = vcombine.low %v268_v43, %v284_v55  ;;  %v326_v36 = vcombine.high %v316_v56, %v4427_v0 }
 0x112   : > { %v3227_v43 = vrot.slane %v1731_v50, %v3147_v3 }
 0x113   : > { %v996_v30 = vrot.slane %v982_v20, %v3147_v3  ;;  %v3190_v15 = vrot.slane %v292_v24, %v3147_v3 }
 0x114   : > { %4478 = vst [vmem:[#allocation21_spill] sm:$0xff] %v3227_v43  ;;  %v1763_v6 = vcombine.high %v3227_v43, %v4427_v0 }
 0x115   : > { %723 = vrot.lane.b32.xlu0 %v3023_v26, %s2718_s6  ;;  %401 = vrot.lane.b32.xlu1 %v307_v13, %s2720_s7  ;;  %v1755_v26 = vrot.slane %v1747_v49, %v3147_v3  ;;  %4475 = vst [vmem:[#allocation18_spill] sm:$0xff] %v3190_v15  ;;  %v324_v49 = vcombine.high %v3190_v15, %v4427_v0 }
 0x116   : > { %v1764_v13 = vcombine.high %v1746_v17, %v4427_v0  ;;  %v1014_v38 = vcombine.high %v996_v30, %v4427_v0 }
 0x119   : > { %1800 = vrot.lane.b32.xlu0 %v1746_v17, %s2720_s7  ;;  %409 = vrot.lane.b32.xlu1 %v316_v56, %s2721_s8  ;;  %v1082_v17 = vcombine.high %v1064_v2, %v4427_v0 }
 0x11d   : > { %1118 = vrot.lane.b32.xlu0 %v1064_v2, %s2720_s7  ;;  %1772 = vrot.lane.b32.xlu1 %v1678_v48, %s2720_s7  ;;  %v1697_v2 = vcombine.high %v1687_v10, %v4427_v0 }
 0x121   : > { %1808 = vrot.lane.b32.xlu0 %v1755_v26, %s2721_s8  ;;  %1090 = vrot.lane.b32.xlu1 %v996_v30, %s2720_s7 }
 0x125   : > { %1768 = vrot.lane.b32.xlu1 %v1695_v35, %s2722_s17  ;;  %397 = vrot.lane.b32.xlu0 %v324_v49, %s2722_s17 }
 0x127   : > { %v3206_v16 = vpop.permute.xlu1 %1847 }
 0x129   : > { %1114 = vrot.lane.b32.xlu1 %v1081_v22, %s2722_s17  ;;  %405 = vrot.lane.b32.xlu0 %v325_v25, %s2723_s19  ;;  %v1765_v22 = vcombine.high %v1755_v26, %v4427_v0  ;;  %v3294_v26 = vrot.slane %v1065_v53, %v3147_v3 }
 0x12b   : > { %v3216_v44 = vpop.permute.xlu0 %1851  ;;  %v3218_v45 = vpop.permute.xlu1 %1855 }
 0x12c   : > { %v1937_v19 = vcombine.low %v3206_v16, %v3218_v45 }
 0x12d   : > { %1086 = vrot.lane.b32.xlu1 %v1013_v52, %s2722_s17  ;;  %413 = vrot.lane.b32.xlu0 %v326_v36, %s2724_s20 }
 0x12e   : > { %v3267_v24 = vrot.slane %v1937_v19, %v2904_v28 }
 0x12f   : > { %v3231_v55 = vpop.permute.xlu0 %1859  ;;  %v3233_v59 = vpop.permute.xlu1 %1845 }
 0x130   : > { %v1953_v39 = vcombine.low %v3216_v44, %v3231_v55  ;;  %v1954_v41 = vcombine.high %v3216_v44, %v3231_v55 }
 0x131   : > { %1776 = vrot.lane.b32.xlu1 %v1696_v60, %s2723_s19  ;;  %1796 = vrot.lane.b32.xlu0 %v1763_v6, %s2722_s17 }
 0x132   : > { %v3258_v57 = vrot.slane %v1953_v39, %v2904_v28  ;;  %v3350_v44 = vrot.slane %v1954_v41, %v2904_v28 }
 0x133   : > { %v3242_v40 = vpop.permute.xlu0 %1849  ;;  %v3244_v50 = vpop.permute.xlu1 %1853 }
 0x134   : > { %v1869_v56 = vcombine.low %v3233_v59, %v3244_v50  ;;  %v1970_v25 = vcombine.high %v3267_v24, %v3258_v57  ;;  %v1870_v15 = vcombine.high %v3233_v59, %v3244_v50 }
 0x135   : > { %1780 = vrot.lane.b32.xlu1 %v1687_v10, %s2721_s8  ;;  %1804 = vrot.lane.b32.xlu0 %v1764_v13, %s2723_s19 }
 0x136   : > { %v3272_v35 = vrot.slane %v1869_v56, %v2904_v28  ;;  %v3288_v39 = vrot.slane %v1970_v25, %v3147_v3 }
 0x137   : > { %v3260_v61 = vpop.permute.xlu0 %1857  ;;  %v2078_v48 = vpop.permute.xlu1 %2077 }
 0x138   : > { %v1885_v20 = vcombine.low %v3242_v40, %v3260_v61 }
 0x139   : > { %1094 = vrot.lane.b32.xlu1 %v1014_v38, %s2723_s19  ;;  %1122 = vrot.lane.b32.xlu0 %v1082_v17, %s2723_s19 }
 0x13a   : > { %v3275_v49 = vrot.slane %v1885_v20, %v2904_v28  ;;  %v3319_v20 = vrot.slane %v1748_v54, %v3147_v3 }
 0x13b   : > { %v2082_v12 = vpop.permute.xlu0 %2081  ;;  %v2086_v30 = vpop.permute.xlu1 %2085 }
 0x13c   : > { %v2167_v36 = vcombine.low %v2078_v48, %v2086_v30  ;;  %v1902_v10 = vcombine.high %v3272_v35, %v3275_v49  ;;  %4479 = vst [vmem:[#allocation22_spill] sm:$0xff] %v3319_v20  ;;  %v2168_v58 = vcombine.high %v2078_v48, %v2086_v30 }
 0x13d   : > { %1784 = vrot.lane.b32.xlu1 %v1697_v2, %s2724_s20  ;;  %1812 = vrot.lane.b32.xlu0 %v1765_v22, %s2724_s20 }
 0x13e   : > { %v3303_v19 = vrot.slane %v2167_v36, %v2904_v28  ;;  %v3313_v17 = vrot.slane %v1902_v10, %v3147_v3 }
 0x13f   : > { %v2090_v60 = vpop.permute.xlu0 %2089  ;;  %v3285_v6 = vpop.permute.xlu1 %1395 }
 0x140   : > { %v2183_v13 = vcombine.low %v2082_v12, %v2090_v60  ;;  %v2184_v55 = vcombine.high %v2082_v12, %v2090_v60 }
 0x141   : > { %2038 = vrot.lane.b32.xlu1 %v3288_v39, %s2720_s7  ;;  %1126 = vrot.lane.b32.xlu0 %v3294_v26, %s2721_s8 }
 0x142   : > { %v3306_v56 = vrot.slane %v2183_v13, %v2904_v28  ;;  %v1938_v13 = vcombine.high %v3206_v16, %v3218_v45  ;;  %v3361_v45 = vrot.slane %v2184_v55, %v2904_v28 }
 0x143   : > { %v3308_v38 = vpop.permute.xlu0 %1399  ;;  %v3310_v53 = vpop.permute.xlu1 %1403 }
 0x144   : > { %v2200_v22 = vcombine.high %v3303_v19, %v3306_v56  ;;  %v1485_v42 = vcombine.low %v3285_v6, %v3310_v53  ;;  %v3356_v5 = vrot.slane %v1938_v13, %v2904_v28  ;;  %v3370_v13 = vrot.slane %v2168_v58, %v2904_v28 }
 0x145   : > { %2010 = vrot.lane.b32.xlu1 %v3313_v17, %s2720_s7  ;;  %1816 = vrot.lane.b32.xlu0 %v3319_v20, %s2725_s22  ;;  %v1486_v43 = vcombine.high %v3285_v6, %v3310_v53 }
 0x146   : > { %v3330_v25 = vrot.slane %v2200_v22, %v3147_v3  ;;  %v3353_v18 = vrot.slane %v1485_v42, %v2904_v28  ;;  %v1985_v60 = vcombine.low %v3356_v5, %v3350_v44  ;;  %v2215_v63 = vcombine.low %v3370_v13, %v3361_v45 }
 0x147   : > { %v3336_v54 = vpop.permute.xlu0 %1407  ;;  %v3338_v36 = vpop.permute.xlu1 %2075  ;;  %v2216_v37 = vcombine.high %v3370_v13, %v3361_v45 }
 0x148   : > { %v1501_v10 = vcombine.low %v3308_v38, %v3336_v54 }
 0x149   : > { %2268 = vrot.lane.b32.xlu0 %v3330_v25, %s2720_s7 }
 0x14a   : > { %v3347_v22 = vrot.slane %v1501_v10, %v2904_v28 }
 0x14b   : > { %v2080_v14 = vpop.permute.xlu0 %2079  ;;  %v2084_v9 = vpop.permute.xlu1 %2083 }
 0x14c   : > { %v1518_v16 = vcombine.high %v3353_v18, %v3347_v22  ;;  %v2099_v10 = vcombine.low %v3338_v36, %v2084_v9 }
 0x14e   : > { %v3365_v12 = vrot.slane %v1518_v16, %v3147_v3  ;;  %v3378_v30 = vrot.slane %v2099_v10, %v2904_v28  ;;  %v3381_v16 = vrot.slane %v1985_v60, %v3147_v3  ;;  %v3395_v60 = vrot.slane %v2215_v63, %v3147_v3 }
 0x14f   : > { %v2088_v41 = vpop.permute.xlu0 %2087  ;;  %v1394_v4 = vpop.permute.xlu1 %1393 }
 0x150   : > { %v2115_v42 = vcombine.low %v2080_v14, %v2088_v41  ;;  %1586 = vrot.lane.b32.xlu0 %v3365_v12, %s2720_s7  ;;  %v2116_v59 = vcombine.high %v2080_v14, %v2088_v41 }
 0x152   : > { %v3375_v48 = vrot.slane %v2115_v42, %v2904_v28  ;;  %v1886_v42 = vcombine.high %v3242_v40, %v3260_v61  ;;  %v3431_v41 = vrot.slane %v2116_v59, %v2904_v28 }
 0x153   : > { %v1398_v55 = vpop.permute.xlu0 %1397  ;;  %v1402_v1 = vpop.permute.xlu1 %1401 }
 0x154   : > { %2046 = vrot.lane.b32.xlu0 %v3381_v16, %s2721_s8  ;;  %v2132_v58 = vcombine.high %v3378_v30, %v3375_v48  ;;  %v1418_v62 = vcombine.high %v1394_v4, %v1402_v1  ;;  %v1417_v10 = vcombine.low %v1394_v4, %v1402_v1  ;;  %v3404_v1 = vrot.slane %v1886_v42, %v2904_v28 }
 0x156   : > { %v3392_v0 = vrot.slane %v2132_v58, %v3147_v3  ;;  %v3407_v4 = vrot.slane %v1418_v62, %v2904_v28  ;;  %v3416_v50 = vrot.slane %v1417_v10, %v2904_v28  ;;  %v2100_v62 = vcombine.high %v3338_v36, %v2084_v9 }
 0x157   : > { %v1406_v2 = vpop.permute.xlu0 %1405  ;;  %v1166_v52 = vpop.permute.xlu1 %1165 }
 0x158   : > { %v1433_v33 = vcombine.low %v1398_v55, %v1406_v2  ;;  %v1434_v11 = vcombine.high %v1398_v55, %v1406_v2  ;;  %2240 = vrot.lane.b32.xlu1 %v3392_v0, %s2720_s7  ;;  %2276 = vrot.lane.b32.xlu0 %v3395_v60, %s2721_s8  ;;  %4480 = vst [vmem:[#allocation23_spill] sm:$0xff] %v3407_v4 }
 0x159   : > { %v3419_v55 = vrot.slane %v1870_v15, %v2904_v28  ;;  %v3441_v8 = vrot.slane %v2100_v62, %v2904_v28 }
 0x15a   : > { %v3410_v63 = vrot.slane %v1433_v33, %v2904_v28  ;;  %v3413_v40 = vrot.slane %v1434_v11, %v2904_v28  ;;  %v1502_v11 = vcombine.high %v3308_v38, %v3336_v54 }
 0x15b   : > { %v1170_v61 = vpop.permute.xlu0 %1169  ;;  %v1174_v2 = vpop.permute.xlu1 %1173  ;;  %v1917_v14 = vcombine.low %v3419_v55, %v3404_v1  ;;  %v2147_v62 = vcombine.low %v3441_v8, %v3431_v41 }
 0x15c   : > { %4481 = vst [vmem:[#allocation24_spill] sm:$0xff] %v3413_v40  ;;  %v1450_v33 = vcombine.high %v3416_v50, %v3410_v63  ;;  %v1256_v42 = vcombine.high %v1166_v52, %v1174_v2  ;;  %v1255_v15 = vcombine.low %v1166_v52, %v1174_v2  ;;  %v3455_v59 = vrot.slane %v1502_v11, %v2904_v28 }
 0x15d   : > { %v3465_v2 = vrot.slane %v1917_v14, %v3147_v3 }
 0x15e   : > { %v3436_v58 = vrot.slane %v1450_v33, %v3147_v3  ;;  %v3446_v38 = vrot.slane %v1256_v42, %v2904_v28  ;;  %v3458_v6 = vrot.slane %v1255_v15, %v2904_v28  ;;  %v3472_v42 = vrot.slane %v1486_v43, %v2904_v28 }
 0x15f   : > { %v1178_v10 = vpop.permute.xlu0 %1177  ;;  %v3433_v51 = vpop.permute.xlu1 %1163 }
 0x160   : > { %v1271_v9 = vcombine.low %v1170_v61, %v1178_v10  ;;  %v1272_v36 = vcombine.high %v1170_v61, %v1178_v10  ;;  %1558 = vrot.lane.b32.xlu1 %v3436_v58, %s2720_s7  ;;  %v1533_v43 = vcombine.low %v3472_v42, %v3455_v59 }
 0x162   : > { %v3449_v52 = vrot.slane %v1271_v9, %v2904_v28  ;;  %v3452_v54 = vrot.slane %v1272_v36, %v2904_v28  ;;  %v3485_v9 = vrot.slane %v2147_v62, %v3147_v3  ;;  %v1986_v62 = vcombine.high %v3356_v5, %v3350_v44 }
 0x163   : > { %v3460_v53 = vpop.permute.xlu0 %1167  ;;  %v3462_v61 = vpop.permute.xlu1 %1171  ;;  %v3511_v47 = vrot.slane %v1533_v43, %v3147_v3  ;;  %v1465_v43 = vcombine.low %v3407_v4, %v3413_v40 }
 0x164   : > { %2018 = vrot.lane.b32.xlu1 %v3465_v2, %s2721_s8  ;;  %v1288_v11 = vcombine.high %v3458_v6, %v3449_v52  ;;  %v1187_v15 = vcombine.low %v3433_v51, %v3462_v61  ;;  %v3518_v46 = vrot.slane %v1986_v62, %v3147_v3 }
 0x165   : > { %v3552_v13 = vrot.slane %v1465_v43, %v3147_v3 }
 0x166   : > { %v3488_v36 = vrot.slane %v1288_v11, %v3147_v3  ;;  %v3504_v11 = vrot.slane %v1187_v15, %v2904_v28 }
 0x167   : > { %v3480_v14 = vpop.permute.xlu0 %1175  ;;  %v3482_v10 = vpop.permute.xlu1 %483 }
 0x168   : > { %4482 = vst [vmem:[#allocation25_spill] sm:$0xff] %v3482_v10  ;;  %v1203_v33 = vcombine.low %v3460_v53, %v3480_v14  ;;  %2248 = vrot.lane.b32.xlu1 %v3485_v9, %s2721_s8  ;;  %1356 = vrot.lane.b32.xlu0 %v3488_v36, %s2720_s7 }
 0x16a   : > { %v3499_v7 = vrot.slane %v1203_v33, %v2904_v28 }
 0x16b   : > { %v3506_v34 = vpop.permute.xlu0 %487  ;;  %v3508_v32 = vpop.permute.xlu1 %491 }
 0x16c   : > { %4483 = vst [vmem:[#allocation26_spill] sm:$0xff] %v3506_v34  ;;  %4484 = vst [vmem:[#allocation27_spill] sm:$0xff] %v3508_v32  ;;  %1594 = vrot.lane.b32.xlu0 %v3511_v47, %s2721_s8  ;;  %v1220_v33 = vcombine.high %v3504_v11, %v3499_v7  ;;  %v573_v5 = vcombine.low %v3482_v10, %v3508_v32  ;;  %v1969_v10 = vcombine.low %v3267_v24, %v3258_v57 }
 0x16e   : > { %v3527_v20 = vrot.slane %v1220_v33, %v3147_v3  ;;  %v3545_v32 = vrot.slane %v573_v5, %v2904_v28  ;;  %v1517_v5 = vcombine.low %v3353_v18, %v3347_v22 }
 0x16f   : > { %v3522_v44 = vpop.permute.xlu0 %495  ;;  %v3524_v15 = vpop.permute.xlu1 %713 }
 0x170   : > { %4485 = vst [vmem:[#allocation28_spill] sm:$0xff] %v3522_v44  ;;  %4486 = vst [vmem:[#allocation29_spill] sm:$0xff] %v3524_v15  ;;  %v589_v62 = vcombine.low %v3506_v34, %v3522_v44  ;;  %1328 = vrot.lane.b32.xlu1 %v3527_v20, %s2720_s7  ;;  %2054 = vrot.lane.b32.xlu0 %v3518_v46, %s2725_s22  ;;  %v3555_v34 = vrot.slane %v2216_v37, %v3147_v3 }
 0x171   : > { %v1918_v44 = vcombine.high %v3419_v55, %v3404_v1 }
 0x172   : > { %v3542_v33 = vrot.slane %v589_v62, %v2904_v28  ;;  %v3580_v62 = vrot.slane %v1969_v10, %v3147_v3 }
 0x173   : > { %v3547_v31 = vpop.permute.xlu0 %717  ;;  %v3549_v45 = vpop.permute.xlu1 %721  ;;  %v3574_v1 = vrot.slane %v1918_v44, %v3147_v3  ;;  %v2131_v44 = vcombine.low %v3378_v30, %v3375_v48  ;;  %v1449_v30 = vcombine.low %v3416_v50, %v3410_v63 }
 0x174   : > { %4487 = vst [vmem:[#allocation30_spill] sm:$0xff] %v3547_v31  ;;  %4488 = vst [vmem:[#allocation31_spill] sm:$0xff] %v3549_v45  ;;  %1566 = vrot.lane.b32.xlu1 %v3552_v13, %s2721_s8  ;;  %2284 = vrot.lane.b32.xlu0 %v3555_v34, %s2725_s22  ;;  %v606_v57 = vcombine.high %v3545_v32, %v3542_v33  ;;  %v803_v24 = vcombine.low %v3524_v15, %v3549_v45  ;;  %v4491_v15 = vmov 0.0  }
 0x175   : > { %4490 = vst [vmem:[#allocation33_spill] sm:$0xff] %v3580_v62  ;;  %v2001_v45 = vcombine.high %v3580_v62, %v4491_v15  ;;  %v3622_v4 = vrot.slane %v2131_v44, %v3147_v3  ;;  %v3639_v44 = vrot.slane %v1449_v30, %v3147_v3  ;;  %v1934_v30 = vcombine.high %v3313_v17, %v4491_v15 }
 0x176   : > { %v3577_v55 = vrot.slane %v606_v57, %v3147_v3  ;;  %v3589_v18 = vrot.slane %v803_v24, %v2904_v28 }
 0x177   : > { %v3569_v37 = vpop.permute.xlu0 %725  ;;  %v3571_v43 = vpop.permute.xlu1 %481  ;;  %4493 = vst [vmem:[#allocation35_spill] sm:$0xff] %v3622_v4  ;;  %4494 = vst [vmem:[#allocation36_spill] sm:$0xff] %v3639_v44 }
 0x178   : > { %4489 = vst [vmem:[#allocation32_spill] sm:$0xff] %v3569_v37  ;;  %v819_v40 = vcombine.low %v3547_v31, %v3569_v37  ;;  %2026 = vrot.lane.b32.xlu1 %v3574_v1, %s2725_s22  ;;  %674 = vrot.lane.b32.xlu0 %v3577_v55, %s2720_s7  ;;  %v3603_v31 = vrot.slane %v1517_v5, %v3147_v3 }
 0x17a   : > { %v3592_v22 = vrot.slane %v819_v40, %v2904_v28  ;;  %4492 = vst [vmem:[#allocation34_spill] sm:$0xff] %v3603_v31  ;;  %v1303_v40 = vcombine.low %v3446_v38, %v3452_v54  ;;  %v1549_v5 = vcombine.high %v3603_v31, %v4491_v15  ;;  %v2163_v31 = vcombine.high %v3622_v4, %v4491_v15 }
 0x17b   : > { %v3596_v10 = vpop.permute.xlu0 %485  ;;  %v3598_v57 = vpop.permute.xlu1 %489  ;;  %v1481_v4 = vcombine.high %v3639_v44, %v4491_v15 }
 0x17c   : > { %v836_v24 = vcombine.high %v3589_v18, %v3592_v22  ;;  %2034 = vrot.lane.b32.xlu1 %v2001_v45, %s2722_s17  ;;  %v1534_v45 = vcombine.high %v3472_v42, %v3455_v59  ;;  %v3630_v63 = vrot.slane %v1303_v40, %v3147_v3  ;;  %v2148_v59 = vcombine.high %v3441_v8, %v3431_v41 }
 0x17d   : > { %v4496_v8 = vcombine.low %v3272_v35, %v3275_v49  ;;  %v4498_v49 = vcombine.low %v3303_v19, %v3306_v56 }
 0x17e   : > { %v3611_v48 = vrot.slane %v836_v24, %v3147_v3  ;;  %v3647_v42 = vrot.slane %v1534_v45, %v3147_v3  ;;  %v1219_v45 = vcombine.low %v3504_v11, %v3499_v7  ;;  %v2164_v7 = vcombine.high %v3392_v0, %v4491_v15 }
 0x17f   : > { %v3615_v37 = vpop.permute.xlu0 %493  ;;  %v3617_v62 = vpop.permute.xlu1 %711  ;;  %v3665_v41 = vrot.slane %v4496_v8, %v3147_v3  ;;  %v3684_v17 = vrot.slane %v4498_v49, %v3147_v3  ;;  %v605_v49 = vcombine.low %v3545_v32, %v3542_v33  ;;  %v1935_v32 = vcombine.high %v3465_v2, %v4491_v15 }
 0x180   : > { %904 = vrot.lane.b32.xlu0 %v3611_v48, %s2720_s7  ;;  %1582 = vrot.lane.b32.xlu1 %v1549_v5, %s2722_s17 }
 0x181   : > { %v1933_v35 = vcombine.high %v3665_v41, %v4491_v15  ;;  %v2231_v8 = vcombine.high %v3684_v17, %v4491_v15 }
 0x183   : > { %v3632_v50 = vpop.permute.xlu0 %715  ;;  %v3634_v24 = vpop.permute.xlu1 %719 }
 0x184   : > { %1364 = vrot.lane.b32.xlu0 %v3630_v63, %s2721_s8  ;;  %2236 = vrot.lane.b32.xlu1 %v2163_v31, %s2722_s17  ;;  %v3659_v31 = vrot.slane %v2148_v59, %v3147_v3  ;;  %v3693_v59 = vrot.slane %v1219_v45, %v3147_v3  ;;  %v1287_v45 = vcombine.low %v3458_v6, %v3449_v52 }
 0x185   : > { %v735_v2 = vcombine.low %v3617_v62, %v3634_v24 }
 0x186   : > { %v1251_v56 = vcombine.high %v3693_v59, %v4491_v15 }
 0x187   : > { %v3649_v40 = vpop.permute.xlu0 %723  ;;  %v3651_v5 = vpop.permute.xlu1 %401 }
 0x188   : > { %4495 = vst [vmem:[#allocation37_spill] sm:$0xff] %v3651_v5  ;;  %1602 = vrot.lane.b32.xlu0 %v3647_v42, %s2725_s22  ;;  %1554 = vrot.lane.b32.xlu1 %v1481_v4, %s2722_s17  ;;  %v751_v6 = vcombine.low %v3632_v50, %v3649_v40 }
 0x18b   : > { %v3671_v5 = vpop.permute.xlu0 %1800  ;;  %v3673_v44 = vpop.permute.xlu1 %409 }
 0x18c   : > { %4497 = vst [vmem:[#allocation38_spill] sm:$0xff] %v3673_v44  ;;  %2256 = vrot.lane.b32.xlu0 %v3659_v31, %s2725_s22  ;;  %2014 = vrot.lane.b32.xlu1 %v1934_v30, %s2723_s19  ;;  %v2002_v30 = vcombine.high %v3288_v39, %v4491_v15  ;;  %v2232_v39 = vcombine.high %v3330_v25, %v4491_v15 }
 0x18d   : > { %v3751_v44 = vrot.slane %v751_v6, %v2904_v28  ;;  %v2165_v6 = vcombine.high %v3485_v9, %v4491_v15 }
 0x18f   : > { %v3688_v4 = vpop.permute.xlu0 %1118  ;;  %v3690_v11 = vpop.permute.xlu1 %1772 }
 0x190   : > { %4499 = vst [vmem:[#allocation39_spill] sm:$0xff] %v3688_v4  ;;  %4500 = vst [vmem:[#allocation40_spill] sm:$0xff] %v3690_v11  ;;  %2006 = vrot.lane.b32.xlu0 %v1933_v35, %s2722_s17  ;;  %2244 = vrot.lane.b32.xlu1 %v2164_v7, %s2723_s19  ;;  %v1482_v35 = vcombine.high %v3436_v58, %v4491_v15  ;;  %v521_v7 = vcombine.low %v3596_v10, %v3615_v37  ;;  %v4524_v4 = vld [vmem:[#allocation14_spill] sm:$0xff] }
 0x191   : > { %v3726_v58 = vrot.slane %v1287_v45, %v3147_v3 }
 0x192   : > { %v3731_v52 = vrot.slane %v521_v7, %v2904_v28 }
 0x193   : > { %v3699_v19 = vpop.permute.xlu0 %1808  ;;  %v3704_v0 = vpop.permute.xlu1 %1090  ;;  %v1319_v45 = vcombine.high %v3726_v58, %v4491_v15 }
 0x194   : > { %2264 = vrot.lane.b32.xlu0 %v2231_v8, %s2722_s17  ;;  %4501 = vst [vmem:[#allocation41_spill] sm:$0xff] %v3704_v0  ;;  %1324 = vrot.lane.b32.xlu1 %v1251_v56, %s2722_s17  ;;  %v505_v56 = vcombine.low %v3571_v43, %v3598_v57 }
 0x196   : > { %v513_v25 = vrot.slane %v505_v56, %v2904_v28  ;;  %v743_v56 = vrot.slane %v735_v2, %v2904_v28  ;;  %v2003_v2 = vcombine.high %v3381_v16, %v4491_v15  ;;  %v2233_v16 = vcombine.high %v3395_v60, %v4491_v15 }
 0x197   : > { %v3717_v8 = vpop.permute.xlu0 %397  ;;  %v3735_v33 = vpop.permute.xlu1 %1768  ;;  %v1320_v60 = vcombine.high %v3488_v36, %v4491_v15 }
 0x198   : > { %4502 = vst [vmem:[#allocation42_spill] sm:$0xff] %v3717_v8  ;;  %2042 = vrot.lane.b32.xlu0 %v2002_v30, %s2723_s19  ;;  %1562 = vrot.lane.b32.xlu1 %v1482_v35, %s2723_s19  ;;  %4503 = vst [vmem:[#allocation43_spill] sm:$0xff] %v3735_v33  ;;  %v3740_v35 = vrot.slane %v605_v49, %v3147_v3  ;;  %v537_v7 = vcombine.low %v513_v25, %v3731_v52 }
 0x199   : > { %v767_v8 = vcombine.low %v743_v56, %v3751_v44 }
 0x19a   : > { %v637_v49 = vcombine.high %v3740_v35, %v4491_v15  ;;  %v3770_v0 = vrot.slane %v537_v7, %v3147_v3 }
 0x19b   : > { %v3737_v30 = vpop.permute.xlu0 %405 }
 0x19c   : > { %4504 = vst [vmem:[#allocation44_spill] sm:$0xff] %v3737_v30  ;;  %2272 = vrot.lane.b32.xlu0 %v2232_v39, %s2723_s19  ;;  %2022 = vrot.lane.b32.xlu1 %v1935_v32, %s2724_s20  ;;  %v3759_v39 = vpop.permute.xlu1 %1114  ;;  %v1550_v32 = vcombine.high %v3365_v12, %v4491_v15  ;;  %v835_v12 = vcombine.low %v3589_v18, %v3592_v22 }
 0x19d   : > { %4506 = vst [vmem:[#allocation46_spill] sm:$0xff] %v3759_v39  ;;  %v569_v9 = vcombine.high %v3770_v0, %v4491_v15 }
 0x19f   : > { %v3753_v30 = vpop.permute.xlu0 %413 }
 0x1a0   : > { %4505 = vst [vmem:[#allocation45_spill] sm:$0xff] %v3753_v30  ;;  %1352 = vrot.lane.b32.xlu0 %v1319_v45, %s2722_s17  ;;  %670 = vrot.lane.b32.xlu1 %v637_v49, %s2722_s17  ;;  %v3778_v45 = vpop.permute.xlu1 %1086  ;;  %v3783_v49 = vrot.slane %v767_v8, %v3147_v3 }
 0x1a1   : > { %4507 = vst [vmem:[#allocation47_spill] sm:$0xff] %v3778_v45 }
 0x1a2   : > { %v799_v18 = vcombine.high %v3783_v49, %v4491_v15 }
 0x1a3   : > { %v3767_v30 = vpop.permute.xlu0 %1796 }
 0x1a4   : > { %1590 = vrot.lane.b32.xlu0 %v1550_v32, %s2723_s19  ;;  %2252 = vrot.lane.b32.xlu1 %v2165_v6, %s2724_s20  ;;  %v3792_v32 = vrot.slane %v835_v12, %v3147_v3  ;;  %v3797_v22 = vpop.permute.xlu1 %1776  ;;  %v1252_v6 = vcombine.high %v3527_v20, %v4491_v15  ;;  %v1483_v12 = vcombine.high %v3552_v13, %v4491_v15 }
 0x1a5   : > { %4508 = vst [vmem:[#allocation48_spill] sm:$0xff] %v3797_v22  ;;  %v1551_v20 = vcombine.high %v3511_v47, %v4491_v15  ;;  %v2004_v13 = vcombine.high %v3518_v46, %v4491_v15  ;;  %v2234_v47 = vcombine.high %v3555_v34, %v4491_v15 }
 0x1a6   : > { %v867_v8 = vcombine.high %v3792_v32, %v4491_v15 }
 0x1a7   : > { %v3786_v7 = vpop.permute.xlu0 %1804 }
 0x1a8   : > { %2050 = vrot.lane.b32.xlu0 %v2003_v2, %s2724_s20  ;;  %642 = vrot.lane.b32.xlu1 %v569_v9, %s2722_s17  ;;  %v3812_v9 = vpop.permute.xlu1 %1780 }
 0x1a9   : > { %4510 = vst [vmem:[#allocation50_spill] sm:$0xff] %v3812_v9  ;;  %v4530_v9 = vld [vmem:[#allocation30_spill] sm:$0xff] }
 0x1ab   : > { %v3804_v2 = vpop.permute.xlu0 %1122 }
 0x1ac   : > { %2280 = vrot.lane.b32.xlu0 %v2233_v16, %s2724_s20  ;;  %872 = vrot.lane.b32.xlu1 %v799_v18, %s2722_s17  ;;  %4509 = vst [vmem:[#allocation49_spill] sm:$0xff] %v3804_v2  ;;  %v1936_v18 = vcombine.high %v3574_v1, %v4491_v15  ;;  %v3823_v36 = vpop.permute.xlu1 %1094  ;;  %v538_v1 = vcombine.high %v513_v25, %v3731_v52  ;;  %v4523_v2 = vld [vmem:[#allocation11_spill] sm:$0xff] }
 0x1ad   : > { %4511 = vst [vmem:[#allocation51_spill] sm:$0xff] %v3823_v36  ;;  %v1188_v52 = vcombine.high %v3433_v51, %v3462_v61  ;;  %v868_v51 = vcombine.high %v3611_v48, %v4491_v15  ;;  %v4525_v39 = vcombine.high %v4523_v2, %v4524_v4  ;;  %v2166_v4 = vcombine.high %v3659_v31, %v4491_v15  ;;  %v4531_v2 = vld [vmem:[#allocation31_spill] sm:$0xff] }
 0x1ae   : > { %v552_v34 = vrot.slane %v538_v1, %v3147_v3  ;;  %v1083_v1 = vcombine.high %v3294_v26, %v4491_v15  ;;  %v4533_v31 = vcombine.high %v3033_v27, %v3036_v29 }
 0x1af   : > { %v3815_v16 = vpop.permute.xlu0 %1812 }
 0x1b0   : > { %900 = vrot.lane.b32.xlu0 %v867_v8, %s2722_s17  ;;  %1332 = vrot.lane.b32.xlu1 %v1252_v6, %s2723_s19  ;;  %v4512_v8 = vcombine.low %v3033_v27, %v3036_v29 }
 0x1b2   : > { %v3832_v6 = vrot.slane %v4512_v8, %v3147_v3  ;;  %v4517_v8 = vcombine.low %v3019_v23, %v3030_v21 }
 0x1b4   : > { %1360 = vrot.lane.b32.xlu0 %v1320_v60, %s2723_s19  ;;  %1570 = vrot.lane.b32.xlu1 %v1483_v12, %s2724_s20  ;;  %4513 = vst [vmem:[#allocation52_spill] sm:$0xff] %v3832_v6  ;;  %v3837_v60 = vpop.permute.xlu0 %1126  ;;  %v392_v46 = vcombine.high %v3832_v6, %v4491_v15  ;;  %v1204_v12 = vcombine.high %v3460_v53, %v3480_v14 }
 0x1b5   : > { %4514 = vst [vmem:[#allocation53_spill] sm:$0xff] %v3837_v60  ;;  %v1552_v60 = vcombine.high %v3647_v42, %v4491_v15  ;;  %v4529_v42 = vld [vmem:[#allocation32_spill] sm:$0xff] }
 0x1b6   : > { %v3858_v53 = vrot.slane %v1204_v12, %v2904_v28  ;;  %v820_v22 = vcombine.high %v4530_v9, %v4529_v42  ;;  %v570_v42 = vcombine.high %v552_v34, %v4491_v15 }
 0x1b8   : > { %1598 = vrot.lane.b32.xlu0 %v1551_v20, %s2724_s20  ;;  %2030 = vrot.lane.b32.xlu1 %v1936_v18, %s2726_s26  ;;  %v768_v20 = vcombine.high %v743_v56, %v3751_v44  ;;  %v3846_v18 = vpop.permute.xlu1 %1784  ;;  %v3852_v25 = vpop.permute.xlu0 %1816  ;;  %v3863_v44 = vrot.slane %v1188_v52, %v2904_v28  ;;  %v3938_v9 = vrot.slane %v820_v22, %v2904_v28 }
 0x1b9   : > { %4515 = vst [vmem:[#allocation54_spill] sm:$0xff] %v3846_v18  ;;  %4516 = vst [vmem:[#allocation55_spill] sm:$0xff] %v3852_v25  ;;  %v4528_v18 = vld [vmem:[#allocation22_spill] sm:$0xff]  ;;  %v506_v25 = vcombine.high %v3571_v43, %v3598_v57 }
 0x1ba   : > { %v782_v14 = vrot.slane %v768_v20, %v3147_v3  ;;  %v1235_v61 = vcombine.low %v3863_v44, %v3858_v53  ;;  %v1321_v20 = vcombine.high %v3630_v63, %v4491_v15 }
 0x1bb   : > { %v3998_v57 = vrot.slane %v506_v25, %v2904_v28 }
 0x1bc   : > { %2058 = vrot.lane.b32.xlu0 %v2004_v13, %s2726_s26  ;;  %2288 = vrot.lane.b32.xlu1 %v2234_v47, %s2726_s26  ;;  %v638_v13 = vcombine.high %v3577_v55, %v4491_v15  ;;  %v3865_v56 = vpop.permute.xlu1 %2038  ;;  %v3872_v55 = vpop.permute.xlu0 %2268  ;;  %v1005_v47 = vrot.slane %v4517_v8, %v3147_v3  ;;  %v1243_v12 = vrot.slane %v1235_v61, %v3147_v3  ;;  %v4521_v61 = vld [vmem:[#allocation28_spill] sm:$0xff] }
 0x1bd   : > { %v800_v29 = vcombine.high %v782_v14, %v4491_v15 }
 0x1c0   : > { %425 = vrot.lane.b32.xlu0 %v392_v46, %s2722_s17  ;;  %646 = vrot.lane.b32.xlu1 %v552_v34, %s2720_s7  ;;  %v3882_v46 = vpop.permute.xlu1 %2010  ;;  %s2645_s17 = scalar_lea.vmem %s2444_s23, 256 }
 0x1c1   : > { %p2646_p11 = scmp.ne.s32.totalorder %s2444_s23, %s2645_s17 }
 0x1c2   : > { %v3884_v48 = vpop.permute.xlu0 %1586 }
 0x1c3   : > { %p2647_p13 = pnand %p2646_p11, %p4574_p12 }
 0x1c4   : > { %678 = vrot.lane.b32.xlu0 %v638_v13, %s2723_s19  ;;  %876 = vrot.lane.b32.xlu1 %v782_v14, %s2720_s7  ;;  %v4518_v13 = vld [vmem:[#allocation23_spill] sm:$0xff]  ;;  %v4534_v14 = vld [vmem:[#allocation9_spill] sm:$0xff] }
 0x1c5   : > { %p2648_p4 = pneg %p2647_p13 }
 0x1c6   : > { %v3898_v36 = vpop.permute.xlu0 %2046 }
 0x1c8   : > { %908 = vrot.lane.b32.xlu0 %v868_v51, %s2723_s19  ;;  %1098 = vrot.lane.b32.xlu1 %v1005_v47, %s2721_s8  ;;  %v4519_v51 = vld [vmem:[#allocation24_spill] sm:$0xff] }
 0x1c9   : > { %v4520_v8 = vcombine.high %v4518_v13, %v4519_v51  ;;  %v1694_v13 = vrot.slane %v4525_v39, %v3147_v3  ;;  %v4526_v51 = vld [vmem:[#allocation27_spill] sm:$0xff] }
 0x1ca   : > { %v3891_v52 = vpop.permute.xlu1 %2240  ;;  %v3922_v11 = vpop.permute.xlu0 %2276 }
 0x1cb   : > { %v1480_v26 = vrot.slane %v4520_v8, %v3147_v3  ;;  %v4527_v8 = vld [vmem:[#allocation25_spill] sm:$0xff] }
 0x1cc   : > { %1130 = vrot.lane.b32.xlu0 %v1083_v1, %s2724_s20  ;;  %1336 = vrot.lane.b32.xlu1 %v1243_v12, %s2721_s8  ;;  %v4522_v1 = vld [vmem:[#allocation26_spill] sm:$0xff] }
 0x1cd   : > { %v590_v45 = vcombine.high %v4522_v1, %v4521_v61  ;;  %v1766_v61 = vcombine.high %v4528_v18, %v4491_v15  ;;  %v1484_v43 = vcombine.high %v1480_v26, %v4491_v15 }
 0x1cf   : > { %v3918_v1 = vrot.slane %v590_v45, %v2904_v28 }
 0x1d0   : > { %1368 = vrot.lane.b32.xlu0 %v1321_v20, %s2724_s20  ;;  %1574 = vrot.lane.b32.xlu1 %v1480_v26, %s2725_s22  ;;  %v574_v20 = vcombine.high %v4527_v8, %v4526_v51  ;;  %v375_v8 = vrot.slane %v4533_v31, %v3147_v3  ;;  %v1015_v31 = vcombine.high %v1005_v47, %v4491_v15 }
 0x1d2   : > { %v3905_v63 = vpop.permute.xlu1 %1558  ;;  %v3927_v39 = vrot.slane %v574_v20, %v2904_v28  ;;  %v393_v25 = vcombine.high %v375_v8, %v4491_v15 }
 0x1d4   : > { %1606 = vrot.lane.b32.xlu0 %v1552_v60, %s2726_s26  ;;  %1788 = vrot.lane.b32.xlu1 %v1694_v13, %s2725_s22  ;;  %v4532_v60 = vld [vmem:[#allocation29_spill] sm:$0xff]  ;;  %v621_v45 = vcombine.low %v3927_v39, %v3918_v1 }
 0x1d5   : > { %v804_v51 = vcombine.high %v4532_v60, %v4531_v2 }
 0x1d6   : > { %v3932_v18 = vpop.permute.xlu1 %2018 }
 0x1d8   : > { %1820 = vrot.lane.b32.xlu0 %v1766_v61, %s2726_s26  ;;  %2260 = vrot.lane.b32.xlu1 %v2166_v4, %s2726_s26  ;;  %v3948_v61 = vrot.slane %v804_v51, %v2904_v28  ;;  %v629_v4 = vrot.slane %v621_v45, %v3147_v3  ;;  %v522_v45 = vcombine.high %v3596_v10, %v3615_v37 }
 0x1d9   : > { %v752_v10 = vcombine.high %v3632_v50, %v3649_v40  ;;  %v1698_v40 = vcombine.high %v1694_v13, %v4491_v15 }
 0x1da   : > { %v3944_v20 = vpop.permute.xlu0 %1356  ;;  %v851_v22 = vcombine.low %v3948_v61, %v3938_v9  ;;  %v3955_v2 = vpop.permute.xlu1 %2248  ;;  %v3986_v37 = vrot.slane %v522_v45, %v2904_v28  ;;  %v639_v13 = vcombine.high %v629_v4, %v4491_v15 }
 0x1dc   : > { %429 = vrot.lane.b32.xlu0 %v375_v8, %s2720_s7  ;;  %650 = vrot.lane.b32.xlu1 %v570_v42, %s2723_s19  ;;  %v859_v34 = vrot.slane %v851_v22, %v3147_v3  ;;  %v4535_v42 = vld [vmem:[#allocation10_spill] sm:$0xff]  ;;  %v1253_v22 = vcombine.high %v1243_v12, %v4491_v15  ;;  %v553_v50 = vcombine.low %v3998_v57, %v3986_v37  ;;  %s2441_s7 = scalar_lea.hbm %s4424_s3, %s2531_s10 }
 0x1dd   : > { %v4536_v33 = vcombine.high %v4534_v14, %v4535_v42  ;;  %v736_v14 = vcombine.high %v3617_v62, %v3634_v24 }
 0x1de   : > { %v3957_v27 = vpop.permute.xlu0 %1594  ;;  %v561_v42 = vrot.slane %v553_v50, %v3147_v3 }
 0x1df   : > { %v4016_v62 = vrot.slane %v736_v14, %v2904_v28 }
 0x1e0   : > { %682 = vrot.lane.b32.xlu0 %v629_v4, %s2721_s8  ;;  %880 = vrot.lane.b32.xlu1 %v800_v29, %s2723_s19  ;;  %v1080_v29 = vrot.slane %v4536_v33, %v3147_v3  ;;  %v4537_v33 = vcombine.high %v3446_v38, %v3452_v54  ;;  %v4007_v38 = vrot.slane %v752_v10, %v2904_v28 }
 0x1e1   : > { %v4538_v4 = vcombine.high %v3019_v23, %v3030_v21 }
 0x1e2   : > { %v3963_v60 = vpop.permute.xlu1 %1328  ;;  %v3965_v51 = vpop.permute.xlu0 %2054  ;;  %v1318_v12 = vrot.slane %v4537_v33, %v3147_v3  ;;  %v783_v24 = vcombine.low %v4016_v62, %v4007_v38  ;;  %v869_v33 = vcombine.high %v859_v34, %v4491_v15 }
 0x1e3   : > { %v1012_v50 = vrot.slane %v4538_v4, %v3147_v3  ;;  %v622_v4 = vcombine.high %v3927_v39, %v3918_v1 }
 0x1e4   : > { %912 = vrot.lane.b32.xlu0 %v859_v34, %s2721_s8  ;;  %1102 = vrot.lane.b32.xlu1 %v1015_v31, %s2724_s20  ;;  %v791_v8 = vrot.slane %v783_v24, %v3147_v3  ;;  %v4539_v34 = vld [vmem:[#allocation36_spill] sm:$0xff] }
 0x1e6   : > { %v3976_v6 = vpop.permute.xlu1 %1566  ;;  %v3981_v47 = vpop.permute.xlu0 %2284 }
 0x1e8   : > { %1134 = vrot.lane.b32.xlu0 %v1080_v29, %s2725_s22  ;;  %1340 = vrot.lane.b32.xlu1 %v1253_v22, %s2724_s20 }
 0x1ea   : > { %v3994_v31 = vpop.permute.xlu1 %2026  ;;  %v4009_v54 = vpop.permute.xlu0 %674 }
 0x1ec   : > { %1372 = vrot.lane.b32.xlu0 %v1318_v12, %s2725_s22  ;;  %1578 = vrot.lane.b32.xlu1 %v1484_v43, %s2726_s26  ;;  %v1236_v43 = vcombine.high %v3863_v44, %v3858_v53 }
 0x1ee   : > { %v4012_v26 = vpop.permute.xlu1 %2034  ;;  %v1250_v23 = vrot.slane %v1236_v43, %v3147_v3 }
 0x1f0   : > { %1792 = vrot.lane.b32.xlu0 %v1698_v40, %s2726_s26  ;;  %433 = vrot.lane.b32.xlu1 %v393_v25, %s2723_s19  ;;  %v1084_v25 = vcombine.high %v1080_v29, %v4491_v15  ;;  %s2728_s19 = smov [#allocation6]  }
 0x1f1   : > { %s2649_s16 = sshll.u32 %s2728_s19, 4  ;;  %s2650_s16 = int_to_ptr.vmem [resolvable:$false] %s2649_s16 }
 0x1f2   : > { %v4022_v45 = vpop.permute.xlu0 %904  ;;  %v4025_v22 = vpop.permute.xlu1 %1582  ;;  %p2652_p5 = scmp.lt.s32.totalorder %s2444_s23, %s2650_s16 }
 0x1f4   : > { %654 = vrot.lane.b32.xlu0 %v561_v42, %s2721_s8  ;;  %686 = vrot.lane.b32.xlu1 %v639_v13, %s2724_s20  ;;  %v1322_v13 = vcombine.high %v1318_v12, %v4491_v15 }
 0x1f6   : > { %v4030_v28 = vpop.permute.xlu0 %1364  ;;  %v2237_v10 = vpop.permute.xlu1 %2236 }
 0x1f8   : > { %884 = vrot.lane.b32.xlu0 %v791_v8, %s2721_s8  ;;  %916 = vrot.lane.b32.xlu1 %v869_v33, %s2724_s20  ;;  %v4540_v33 = vld [vmem:[#allocation35_spill] sm:$0xff] }
 0x1f9   : > { %v2291_v29 = vsel %vm452_vm3, %v4540_v33, %v2237_v10  ;;  %v571_v33 = vcombine.high %v561_v42, %v4491_v15  ;;  %v636_v42 = vrot.slane %v622_v4, %v3147_v3 }
 0x1fa   : > { %v4038_v14 = vpop.permute.xlu0 %1602  ;;  %v1555_v40 = vpop.permute.xlu1 %1554  ;;  %v2292_v12 = vsel %vm454_vm4, %v2291_v29, %v3891_v52 }
 0x1fb   : > { %v1609_v24 = vsel %vm452_vm3, %v4539_v34, %v1555_v40 }
 0x1fc   : > { %1106 = vrot.lane.b32.xlu0 %v1012_v50, %s2725_s22  ;;  %1138 = vrot.lane.b32.xlu1 %v1084_v25, %s2726_s26  ;;  %v1610_v53 = vsel %vm454_vm4, %v1609_v24, %v3905_v63  ;;  %v4541_v63 = vld [vmem:[#allocation12_spill] sm:$0xff]  ;;  %v4542_v25 = vld [vmem:[#allocation13_spill] sm:$0xff] }
 0x1fd   : > { %v4543_v34 = vcombine.low %v4541_v63, %v4542_v25 }
 0x1fe   : > { %v4051_v44 = vpop.permute.xlu0 %2256  ;;  %v2015_v21 = vpop.permute.xlu1 %2014 }
 0x1ff   : > { %v384_v24 = vrot.slane %v4543_v34, %v3147_v3 }
 0x200   : > { %1344 = vrot.lane.b32.xlu0 %v1250_v23, %s2725_s22  ;;  %1376 = vrot.lane.b32.xlu1 %v1322_v13, %s2726_s26 }
 0x202   : > { %v2007_v40 = vpop.permute.xlu0 %2006  ;;  %v2245_v43 = vpop.permute.xlu1 %2244 }
 0x203   : > { %v2061_v10 = vsel %vm452_vm3, %v3665_v41, %v2007_v40  ;;  %v2293_v13 = vsel %vm456_vm5, %v2292_v12, %v2245_v43  ;;  %v852_v41 = vcombine.high %v3948_v61, %v3938_v9  ;;  %v1254_v43 = vcombine.high %v1250_v23, %v4491_v15 }
 0x204   : > { %v2062_v1 = vsel %vm454_vm4, %v2061_v10, %v3882_v46  ;;  %437 = vrot.lane.b32.xlu0 %v384_v24, %s2721_s8  ;;  %658 = vrot.lane.b32.xlu1 %v571_v33, %s2724_s20  ;;  %v2294_v52 = vsel %vm458_vm6, %v2293_v13, %v3955_v2  ;;  %v801_v46 = vcombine.high %v791_v8, %v4491_v15  ;;  %v4544_v33 = vld [vmem:[#allocation33_spill] sm:$0xff]  ;;  %v4545_v13 = vld [vmem:[#allocation34_spill] sm:$0xff]  ;;  %s2429_s8 = scalar_lea.sflag [#allocation5], %s2846_s5 }
 0x205   : > { %v2063_v39 = vsel %vm456_vm5, %v2062_v1, %v2015_v21  ;;  %v866_v61 = vrot.slane %v852_v41, %v3147_v3  ;;  %v1616_v1 = vsel %vm452_vm3, %v4545_v13, %v4025_v22 }
 0x206   : > { %v2265_v29 = vpop.permute.xlu0 %2264  ;;  %v2064_v40 = vsel %vm458_vm6, %v2063_v39, %v3932_v18  ;;  %v1325_v34 = vpop.permute.xlu1 %1324  ;;  %v1016_v18 = vcombine.high %v1012_v50, %v4491_v15  ;;  %v394_v50 = vcombine.high %v384_v24, %v4491_v15  ;;  %v2068_v24 = vsel %vm452_vm3, %v4544_v33, %v4012_v26 }
 0x207   : > { %v1379_v12 = vsel %vm452_vm3, %v3693_v59, %v1325_v34  ;;  %v2069_v22 = vsel %vm454_vm4, %v2068_v24, %v3865_v56 }
 0x208   : > { %690 = vrot.lane.b32.xlu0 %v636_v42, %s2725_s22  ;;  %888 = vrot.lane.b32.xlu1 %v801_v46, %s2724_s20  ;;  %v4090_v2 = vsel %vm454_vm4, %v1379_v12, %v3963_v60  ;;  %v554_v60 = vcombine.high %v3998_v57, %v3986_v37  ;;  %v784_v37 = vcombine.high %v4016_v62, %v4007_v38 }
 0x20a   : > { %v2043_v9 = vpop.permute.xlu0 %2042  ;;  %v1563_v21 = vpop.permute.xlu1 %1562  ;;  %v568_v23 = vrot.slane %v554_v60, %v3147_v3 }
 0x20b   : > { %v1611_v4 = vsel %vm456_vm5, %v1610_v53, %v1563_v21 }
 0x20c   : > { %920 = vrot.lane.b32.xlu0 %v866_v61, %s2725_s22  ;;  %1110 = vrot.lane.b32.xlu1 %v1016_v18, %s2726_s26  ;;  %v4099_v59 = vsel %vm458_vm6, %v1611_v4, %v3976_v6 }
 0x20e   : > { %v2273_v8 = vpop.permute.xlu0 %2272  ;;  %v2023_v10 = vpop.permute.xlu1 %2022 }
 0x20f   : > { %v2065_v53 = vsel %vm460_vm7, %v2064_v40, %v2023_v10  ;;  %v2298_v40 = vsel %vm452_vm3, %v3684_v17, %v2265_v29  ;;  %v4548_v10 = vld [vmem:[#allocation16_spill] sm:$0xff] }
 0x210   : > { %1348 = vrot.lane.b32.xlu0 %v1254_v43, %s2726_s26  ;;  %441 = vrot.lane.b32.xlu1 %v394_v50, %s2724_s20  ;;  %v4110_v6 = vsel %vm462_vm8, %v2065_v53, %v3994_v31  ;;  %v640_v31 = vcombine.high %v636_v42, %v4491_v15  ;;  %v2299_v17 = vsel %vm454_vm4, %v2298_v40, %v3872_v55  ;;  %v4547_v43 = vld [vmem:[#allocation15_spill] sm:$0xff]  ;;  %s2651_s20 = scalar_lea.vmem %s2650_s16, 512 }
 0x211   : > { %v4549_v50 = vcombine.high %v4547_v43, %v4548_v10  ;;  %p2653_p7 = scmp.lt.s32.totalorder %s2651_s20, %s2645_s17 }
 0x212   : > { %v1353_v57 = vpop.permute.xlu0 %1352  ;;  %v671_v39 = vpop.permute.xlu1 %670 }
 0x213   : > { %v1386_v41 = vsel %vm452_vm3, %v3726_v58, %v1353_v57  ;;  %v704_v38 = vsel %vm452_vm3, %v3740_v35, %v671_v39  ;;  %v1617_v58 = vsel %vm454_vm4, %v1616_v1, %v3884_v48  ;;  %v798_v35 = vrot.slane %v784_v37, %v3147_v3  ;;  %p2654_p8 = por %p2653_p7, %p2652_p5 }
 0x214   : > { %662 = vrot.lane.b32.xlu0 %v568_v23, %s2725_s22  ;;  %v1387_v62 = vsel %vm454_vm4, %v1386_v41, %v3944_v20  ;;  %694 = vrot.lane.b32.xlu1 %v640_v31, %s2726_s26  ;;  %v4132_v26 = vsel %vm454_vm4, %v704_v38, %v4009_v54  ;;  %v2070_v20 = vsel %vm456_vm5, %v2069_v22, %v2043_v9 }
 0x215   : > { %v870_v54 = vcombine.high %v866_v61, %v4491_v15  ;;  %v2071_v29 = vsel %vm458_vm6, %v2070_v20, %v3898_v36  ;;  %v2727_v36 = vmov 0   ;;  %v802_v4 = vcombine.high %v798_v35, %v4491_v15  ;;  %p2655_p10 = pnand %p2654_p8, %p2648_p4 }
 0x216   : > { %v1591_v42 = vpop.permute.xlu0 %1590  ;;  %v2253_v34 = vpop.permute.xlu1 %2252  ;;  %2594 = vset.pattern.permute.xlu0 %v2727_v36  ;;  %v323_v53 = vrot.slane %v4549_v50, %v3147_v3 }
 0x217   : > { %v1618_v46 = vsel %vm456_vm5, %v1617_v58, %v1591_v42  ;;  %v2295_v12 = vsel %vm460_vm7, %v2294_v52, %v2253_v34  ;;  %v4546_v52 = vcombine.high %v4541_v63, %v4542_v25 }
 0x218   : > { %892 = vrot.lane.b32.xlu0 %v798_v35, %s2725_s22  ;;  %v1619_v56 = vsel %vm458_vm6, %v1618_v46, %v3957_v27  ;;  %924 = vrot.lane.b32.xlu1 %v870_v54, %s2726_s26  ;;  %v4151_v48 = vsel %vm462_vm8, %v2295_v12, %v4051_v44  ;;  %v2300_v27 = vsel %vm456_vm5, %v2299_v17, %v2273_v8 }
 0x219   : > { %v391_v61 = vrot.slane %v4546_v52, %v3147_v3  ;;  %v572_v44 = vcombine.high %v568_v23, %v4491_v15  ;;  %v2301_v63 = vsel %vm458_vm6, %v2300_v27, %v3922_v11  ;;  %v327_v33 = vcombine.high %v323_v53, %v4491_v15 }
 0x21a   : > { %v2051_v9 = vpop.permute.xlu0 %2050  ;;  %v643_v21 = vpop.permute.xlu1 %642 }
 0x21b   : > { %v2072_v18 = vsel %vm460_vm7, %v2071_v29, %v2051_v9  ;;  %v395_v11 = vcombine.high %v391_v61, %v4491_v15 }
 0x21c   : > { %445 = vrot.lane.b32.xlu0 %v391_v61, %s2725_s22  ;;  %v2073_v55 = vsel %vm462_vm8, %v2072_v18, %v3965_v51  ;;  %666 = vrot.lane.b32.xlu1 %v572_v44, %s2726_s26 }
 0x21e   : > { %v2281_v25 = vpop.permute.xlu0 %2280  ;;  %v873_v60 = vpop.permute.xlu1 %872 }
 0x21f   : > { %v2302_v8 = vsel %vm460_vm7, %v2301_v63, %v2281_v25 }
 0x220   : > { %896 = vrot.lane.b32.xlu0 %v802_v4, %s2726_s26  ;;  %v2303_v51 = vsel %vm462_vm8, %v2302_v8, %v3981_v47  ;;  %417 = vrot.lane.b32.xlu1 %v323_v53, %s2725_s22  ;;  %v2339_v47 = vld [vmem:[%s4423_s2] sm:$0xff]  ;;  %v4552_v8 = vld [vmem:[#allocation52_spill] sm:$0xff] }
 0x222   : > { %v901_v37 = vpop.permute.xlu0 %900  ;;  %v1333_v57 = vpop.permute.xlu1 %1332 }
 0x223   : > { %v934_v23 = vsel %vm452_vm3, %v3792_v32, %v901_v37  ;;  %v1381_v24 = vsel %vm456_vm5, %v4090_v2, %v1333_v57  ;;  %v4553_v57 = vld [vmem:[#allocation43_spill] sm:$0xff] }
 0x224   : > { %449 = vrot.lane.b32.xlu0 %v395_v11, %s2726_s26  ;;  %v935_v3 = vsel %vm454_vm4, %v934_v23, %v4022_v45  ;;  %421 = vrot.lane.b32.xlu1 %v327_v33, %s2726_s26  ;;  %v4554_v23 = vld [vmem:[#allocation17_spill] sm:$0xff] }
 0x225   : > { %v1823_v33 = vsel %vm452_vm3, %v4554_v23, %v4553_v57  ;;  %v4561_v23 = vld [vmem:[#allocation39_spill] sm:$0xff] }
 0x226   : > { %v1361_v13 = vpop.permute.xlu0 %1360  ;;  %v1571_v1 = vpop.permute.xlu1 %1570 }
 0x227   : > { %v1388_v32 = vsel %vm456_vm5, %v1387_v62, %v1361_v13  ;;  %v4196_v15 = vsel %vm460_vm7, %v4099_v59, %v1571_v1  ;;  %v4556_v1 = vld [vmem:[#allocation48_spill] sm:$0xff] }
 0x228   : > { %v4200_v2 = vsel %vm458_vm6, %v1388_v32, %v4030_v28  ;;  %2342 = vperm.xlu0 %2594, %v2339_v47   ;;  %v697_v28 = vsel %vm452_vm3, %v3770_v0, %v643_v21 }
 0x22a   : > { %v1599_v45 = vpop.permute.xlu0 %1598  ;;  %v2031_v39 = vpop.permute.xlu1 %2030 }
 0x22b   : > { %v1620_v41 = vsel %vm460_vm7, %v1619_v56, %v1599_v45  ;;  %v2067_v45 = vsel %vm464_vm10, %v4110_v6, %v2031_v39 }
 0x22c   : > { %v4205_v31 = vsel %vm462_vm8, %v1620_v41, %v4038_v14  ;;  %v927_v14 = vsel %vm452_vm3, %v3783_v49, %v873_v60  ;;  %v4550_v49 = vld [vmem:[#allocation21_spill] sm:$0xff] }
 0x22e   : > { %v2059_v38 = vpop.permute.xlu0 %2058  ;;  %v2289_v62 = vpop.permute.xlu1 %2288 }
 0x22f   : > { %v2304_v59 = vsel %vm464_vm10, %v2303_v51, %v2289_v62  ;;  %v2074_v21 = vsel %vm464_vm10, %v2073_v55, %v2059_v38  ;;  %v4557_v38 = vld [vmem:[#allocation50_spill] sm:$0xff] }
 0x230   : > { %2522 = vmatprep.subr.msk.mxu0 %vm2329_vm9, %v2304_v59  ;;  %v2326_v25 = vrot.slane %v2074_v21, 4  ;;  %v4558_v59 = vld [vmem:[#allocation54_spill] sm:$0xff] }
 0x232   : > { %v426_v22 = vpop.permute.xlu0 %425  ;;  %v647_v58 = vpop.permute.xlu1 %646 }
 0x233   : > { %v698_v42 = vsel %vm454_vm4, %v697_v28, %v647_v58  ;;  %v2325_v28 = vrot.slane %v2067_v45, 4  ;;  %v4564_v45 = vld [vmem:[#allocation47_spill] sm:$0xff] }
 0x236   : > { %v679_v35 = vpop.permute.xlu0 %678  ;;  %v877_v40 = vpop.permute.xlu1 %876 }
 0x237   : > { %v4216_v20 = vsel %vm456_vm5, %v4132_v26, %v679_v35  ;;  %v4219_v34 = vsel %vm454_vm4, %v927_v14, %v877_v40  ;;  %v1830_v26 = vsel %vm452_vm3, %v4550_v49, %v3767_v30  ;;  %v4551_v30 = vld [vmem:[#allocation55_spill] sm:$0xff] }
 0x238   : > { %v1831_v52 = vsel %vm454_vm4, %v1830_v26, %v3671_v5 }
 0x239   : > { %v1832_v61 = vsel %vm456_vm5, %v1831_v52, %v3786_v7 }
 0x23a   : > { %v909_v46 = vpop.permute.xlu0 %908  ;;  %v4221_v54 = vpop.permute.xlu1 %1098  ;;  %v1833_v44 = vsel %vm458_vm6, %v1832_v61, %v3699_v19  ;;  %v466_v19 = vsel %vm452_vm3, %v4552_v8, %v426_v22 }
 0x23b   : > { %v4224_v0 = vsel %vm456_vm5, %v935_v3, %v909_v46  ;;  %v1834_v36 = vsel %vm460_vm7, %v1833_v44, %v3815_v16  ;;  %v4555_v3 = vld [vmem:[#allocation40_spill] sm:$0xff] }
 0x23c   : > { %v1835_v63 = vsel %vm462_vm8, %v1834_v36, %v4551_v30  ;;  %v1824_v47 = vsel %vm454_vm4, %v1823_v33, %v4555_v3 }
 0x23d   : > { %v1825_v32 = vsel %vm456_vm5, %v1824_v47, %v4556_v1  ;;  %v4563_v1 = vld [vmem:[#allocation53_spill] sm:$0xff] }
 0x23e   : > { %v4226_v12 = vpop.permute.xlu0 %1130  ;;  %v1337_v56 = vpop.permute.xlu1 %1336  ;;  %v1826_v62 = vsel %vm458_vm6, %v1825_v32, %v4557_v38 }
 0x23f   : > { %v4229_v17 = vsel %vm458_vm6, %v1381_v24, %v1337_v56  ;;  %v1827_v22 = vsel %vm460_vm7, %v1826_v62, %v4558_v59 }
 0x242   : > { %v1369_v29 = vpop.permute.xlu0 %1368  ;;  %v4234_v9 = vpop.permute.xlu1 %1574 }
 0x243   : > { %v1390_v61 = vsel %vm460_vm7, %v4200_v2, %v1369_v29 }
 0x246   : > { %v1607_v27 = vpop.permute.xlu0 %1606  ;;  %v1789_v18 = vpop.permute.xlu1 %1788 }
 0x247   : > { %v1828_v58 = vsel %vm462_vm8, %v1827_v22, %v1789_v18  ;;  %v1622_v52 = vsel %vm464_vm10, %v4205_v31, %v1607_v27  ;;  %v1614_v31 = vsel %vm462_vm8, %v4196_v15, %v4234_v9  ;;  %v4562_v9 = vld [vmem:[#allocation49_spill] sm:$0xff] }
 0x248   : > { %v2320_v18 = vrot.slane %v1622_v52, 4 }
 0x24a   : > { %v1821_v4 = vpop.permute.xlu0 %1820  ;;  %v2261_v60 = vpop.permute.xlu1 %2260 }
 0x24b   : > { %v1836_v5 = vsel %vm464_vm10, %v1835_v63, %v1821_v4  ;;  %v2297_v7 = vsel %vm464_vm10, %v4151_v48, %v2261_v60 }
 0x24c   : > { %v2337_v55 = vsel %vm2329_vm9, %v1836_v5, %v2326_v25  ;;  %2523 = vmatpush1.msk.msra.mxu0 %vm2329_vm9, %v2297_v7  ;;  %v4559_v7 = vld [vmem:[#allocation46_spill] sm:$0xff] }
 0x24d   : > { %2379 = vmatprep.subr.mxu0 %v2337_v55  ;;  %v4560_v55 = vld [vmem:[#allocation19_spill] sm:$0xff] }
 0x24e   : > { %v430_v16 = vpop.permute.xlu0 %429  ;;  %v651_v43 = vpop.permute.xlu1 %650  ;;  %v1148_v8 = vsel %vm452_vm3, %v4560_v55, %v4559_v7 }
 0x24f   : > { %v4255_v10 = vsel %vm454_vm4, %v466_v19, %v430_v16  ;;  %v4258_v50 = vsel %vm456_vm5, %v698_v42, %v651_v43  ;;  %v1149_v33 = vsel %vm454_vm4, %v1148_v8, %v4561_v23  ;;  %v4571_v8 = vld [vmem:[#allocation44_spill] sm:$0xff] }
 0x250   : > { %v1150_v47 = vsel %vm456_vm5, %v1149_v33, %v4562_v9 }
 0x251   : > { %v1151_v32 = vsel %vm458_vm6, %v1150_v47, %v4563_v1 }
 0x252   : > { %v4260_v53 = vpop.permute.xlu0 %682  ;;  %v4262_v51 = vpop.permute.xlu1 %880 }
 0x256   : > { %v913_v48 = vpop.permute.xlu0 %912  ;;  %v4264_v37 = vpop.permute.xlu1 %1102 }
 0x25a   : > { %v1135_v11 = vpop.permute.xlu0 %1134  ;;  %v1341_v24 = vpop.permute.xlu1 %1340 }
 0x25b   : > { %v1383_v19 = vsel %vm460_vm7, %v4229_v17, %v1341_v24  ;;  %v1152_v17 = vsel %vm460_vm7, %v1151_v32, %v4226_v12  ;;  %v4567_v12 = vld [vmem:[#allocation51_spill] sm:$0xff] }
 0x25c   : > { %v1153_v62 = vsel %vm462_vm8, %v1152_v17, %v1135_v11 }
 0x25e   : > { %v1373_v13 = vpop.permute.xlu0 %1372  ;;  %v1579_v41 = vpop.permute.xlu1 %1578 }
 0x25f   : > { %v1391_v44 = vsel %vm462_vm8, %v1390_v61, %v1373_v13  ;;  %v1615_v29 = vsel %vm464_vm10, %v1614_v31, %v1579_v41  ;;  %v4565_v41 = vld [vmem:[#allocation20_spill] sm:$0xff]  ;;  %v929_v31 = vsel %vm456_vm5, %v4219_v34, %v4262_v51 }
 0x260   : > { %v2319_v16 = vrot.slane %v1615_v29, 4  ;;  %v1141_v38 = vsel %vm452_vm3, %v4565_v41, %v4564_v45  ;;  %v4570_v29 = vld [vmem:[#allocation37_spill] sm:$0xff] }
 0x261   : > { %v2338_v45 = vld [vmem:[%s4422_s1] sm:$0xff] }
 0x262   : > { %v1793_v42 = vpop.permute.xlu0 %1792  ;;  %v4280_v35 = vpop.permute.xlu1 %433 }
 0x263   : > { %v1829_v14 = vsel %vm464_vm10, %v1828_v58, %v1793_v42  ;;  %v4566_v58 = vld [vmem:[#allocation41_spill] sm:$0xff] }
 0x264   : > { %v2336_v40 = vsel %vm2329_vm9, %v1829_v14, %v2325_v28  ;;  %v937_v28 = vsel %vm458_vm6, %v4224_v0, %v913_v48  ;;  %v1142_v42 = vsel %vm454_vm4, %v1141_v38, %v4566_v58  ;;  %v4569_v0 = vld [vmem:[#allocation18_spill] sm:$0xff] }
 0x265   : > { %2380 = vmatpush1.msra.mxu0 %v2336_v40  ;;  %v1143_v52 = vsel %vm456_vm5, %v1142_v42, %v4567_v12 }
 0x266   : > { %v4284_v46 = vpop.permute.xlu0 %654  ;;  %v4286_v6 = vpop.permute.xlu1 %686  ;;  %v1144_v11 = vsel %vm458_vm6, %v1143_v52, %v4221_v54 }
 0x267   : > { %v700_v34 = vsel %vm458_vm6, %v4258_v50, %v4284_v46 }
 0x26a   : > { %v885_v39 = vpop.permute.xlu0 %884  ;;  %v917_v56 = vpop.permute.xlu1 %916 }
 0x26b   : > { %v938_v14 = vsel %vm460_vm7, %v937_v28, %v917_v56  ;;  %v1145_v56 = vsel %vm460_vm7, %v1144_v11, %v4264_v37  ;;  %v707_v37 = vsel %vm458_vm6, %v4216_v20, %v4260_v53  ;;  %v930_v55 = vsel %vm458_vm6, %v929_v31, %v885_v39 }
 0x26c   : > { %v468_v39 = vsel %vm456_vm5, %v4255_v10, %v4280_v35  ;;  %v4573_v10 = vld [vmem:[#allocation45_spill] sm:$0xff] }
 0x26e   : > { %v1107_v49 = vpop.permute.xlu0 %1106  ;;  %v1139_v26 = vpop.permute.xlu1 %1138 }
 0x26f   : > { %v1154_v22 = vsel %vm464_vm10, %v1153_v62, %v1139_v26 }
 0x270   : > { %v2314_v61 = vrot.slane %v1154_v22, 4 }
 0x272   : > { %v1345_v21 = vpop.permute.xlu0 %1344  ;;  %v1377_v36 = vpop.permute.xlu1 %1376 }
 0x273   : > { %v1392_v30 = vsel %vm464_vm10, %v1391_v44, %v1377_v36  ;;  %v1384_v43 = vsel %vm462_vm8, %v1383_v19, %v1345_v21  ;;  %v4568_v44 = vld [vmem:[#allocation42_spill] sm:$0xff]  ;;  %v708_v19 = vsel %vm460_vm7, %v707_v37, %v4286_v6 }
 0x274   : > { %v2335_v63 = vsel %vm2329_vm9, %v1392_v30, %v2320_v18  ;;  %v453_v48 = vsel %vm452_vm3, %v4569_v0, %v4568_v44  ;;  %v1146_v30 = vsel %vm462_vm8, %v1145_v56, %v1107_v49 }
 0x275   : > { %2381 = vmatprep.subr.mxu0 %v2335_v63  ;;  %v455_v7 = vsel %vm454_vm4, %v453_v48, %v4570_v29 }
 0x276   : > { %v4295_v25 = vpop.permute.xlu0 %437  ;;  %v659_v4 = vpop.permute.xlu1 %658  ;;  %v457_v49 = vsel %vm456_vm5, %v455_v7, %v4571_v8 }
 0x277   : > { %v469_v46 = vsel %vm458_vm6, %v468_v39, %v4295_v25 }
 0x27a   : > { %v691_v60 = vpop.permute.xlu0 %690  ;;  %v889_v5 = vpop.permute.xlu1 %888 }
 0x27b   : > { %v931_v51 = vsel %vm460_vm7, %v930_v55, %v889_v5  ;;  %v4572_v5 = vld [vmem:[#allocation38_spill] sm:$0xff] }
 0x27c   : > { %v459_v33 = vsel %vm458_vm6, %v457_v49, %v4572_v5 }
 0x27d   : > { %v461_v35 = vsel %vm460_vm7, %v459_v33, %v4573_v10 }
 0x27e   : > { %v921_v2 = vpop.permute.xlu0 %920  ;;  %v1111_v27 = vpop.permute.xlu1 %1110 }
 0x27f   : > { %v939_v21 = vsel %vm462_vm8, %v938_v14, %v921_v2  ;;  %v1147_v54 = vsel %vm464_vm10, %v1146_v30, %v1111_v27  ;;  %v701_v27 = vsel %vm460_vm7, %v700_v34, %v659_v4 }
 0x282   : > { %v1349_v57 = vpop.permute.xlu0 %1348  ;;  %v442_v3 = vpop.permute.xlu1 %441 }
 0x283   : > { %v1385_v15 = vsel %vm464_vm10, %v1384_v43, %v1349_v57  ;;  %v2313_v43 = vrot.slane %v1147_v54, 4 }
 0x284   : > { %v2334_v13 = vsel %vm2329_vm9, %v1385_v15, %v2319_v16  ;;  %v709_v16 = vsel %vm462_vm8, %v708_v19, %v691_v60  ;;  %v470_v15 = vsel %vm460_vm7, %v469_v46, %v442_v3 }
 0x285   : > { %2382 = vmatpush1.msra.mxu0 %v2334_v13 }
 0x286   : > { %v663_v24 = vpop.permute.xlu0 %662  ;;  %v695_v59 = vpop.permute.xlu1 %694 }
 0x287   : > { %v710_v6 = vsel %vm464_vm10, %v709_v16, %v695_v59  ;;  %v702_v57 = vsel %vm462_vm8, %v701_v27, %v663_v24 }
 0x288   : > { %v2308_v9 = vrot.slane %v710_v6, 4 }
 0x28a   : > { %v893_v40 = vpop.permute.xlu0 %892  ;;  %v925_v18 = vpop.permute.xlu1 %924 }
 0x28b   : > { %v940_v26 = vsel %vm464_vm10, %v939_v21, %v925_v18  ;;  %v932_v20 = vsel %vm462_vm8, %v931_v51, %v893_v40 }
 0x28c   : > { %v2333_v36 = vsel %vm2329_vm9, %v940_v26, %v2314_v61 }
 0x28d   : > { %2383 = vmatprep.subr.mxu0 %v2333_v36 }
 0x28e   : > { %v446_v63 = vpop.permute.xlu0 %445  ;;  %v667_v2 = vpop.permute.xlu1 %666 }
 0x28f   : > { %v703_v4 = vsel %vm464_vm10, %v702_v57, %v667_v2  ;;  %v471_v47 = vsel %vm462_vm8, %v470_v15, %v446_v63 }
 0x290   : > { %v2307_v25 = vrot.slane %v703_v4, 4 }
 0x292   : > { %v897_v53 = vpop.permute.xlu0 %896  ;;  %v418_v23 = vpop.permute.xlu1 %417 }
 0x293   : > { %v933_v50 = vsel %vm464_vm10, %v932_v20, %v897_v53  ;;  %v463_v1 = vsel %vm462_vm8, %v461_v35, %v418_v23 }
 0x294   : > { %v2332_v60 = vsel %vm2329_vm9, %v933_v50, %v2313_v43 }
 0x295   : > { %2384 = vmatpush1.msra.mxu0 %v2332_v60 }
 0x296   : > { %v450_v13 = vpop.permute.xlu0 %449  ;;  %v422_v32 = vpop.permute.xlu1 %421 }
 0x297   : > { %v472_v17 = vsel %vm464_vm10, %v471_v47, %v450_v13  ;;  %v465_v24 = vsel %vm464_vm10, %v463_v1, %v422_v32 }
 0x298   : > { %v2331_v3 = vsel %vm2329_vm9, %v472_v17, %v2308_v9  ;;  %v2330_v41 = vsel %vm2329_vm9, %v465_v24, %v2307_v25 }
 0x299   : > { %2385 = vmatprep.subr.mxu0 %v2331_v3 }
 0x29a   : > { %2386 = vmatpush1.msra.mxu0 %v2330_v41 }
 0x29b   : > { %2524 = vmatmul.mubr.msk.f32.vlgmr.msra.gmra.mxu0 %vm2345_vm11, %v2338_v45 }
 0x2a3   : > { %v2343_v38 = vpop.permute.xlu0 %2342 }
 0x35b   : > { %v2421_v62 = vpop.f32.mrf.mxu0 }
 0x35c   : > { %v2422_v59 = vadd.f32 %v2421_v62, %v2343_v38 }
 0x35d   : > { %v2423_v22 = vpop.f32.mrf.mxu0 }
 0x35e   : > { %2426 = vst [vmem:[%s188_s11] sm:$0xff] %v2422_v59  ;;  %v2424_v28 = vadd.f32 %v2423_v22, %v2343_v38 }
 0x360   : > { %2427 = vst [vmem:[%s188_s11 + $0x8] sm:$0xff] %v2424_v28 }
 0x361   : > { %2658 = shalt.err (!%p2655_p10)
}
 0x362   : > { %s2659_s22 = scalar_lea.hbm %s2441_s7, 256  ;;  %s2663_s27 = scalar_lea.hbm %s4424_s3, 512 }
 0x363   : > { %p2660_p0 = scmp.ne.s32.totalorder %s2441_s7, %s2659_s22  ;;  %p2664_p1 = scmp.lt.s32.totalorder %s2441_s7, %s4424_s3 }
 0x364   : > { %p2665_p3 = scmp.lt.s32.totalorder %s2663_s27, %s2659_s22 }
 0x365   : > { %p2661_p2 = pnand %p2660_p0, %p4574_p12 }
 0x366   : > { %p2666_p6 = por %p2665_p3, %p2664_p1 }
 0x367   : > { %p2662_p9 = pneg %p2661_p2 }
 0x369   : > { %p2667_p11 = pnand %p2666_p6, %p2662_p9 }
 0x36b   : > { %2670 = shalt.err (!%p2667_p11)
}
 0x36c   : > { %2534 = dma.vmem_to_hbm [thread:$0]  (%p4574_p12), %s2444_s23, 256, %s2441_s7, %s2429_s8  }
 0x36d PF: > { %s2455_s30 = sand.u32 1, %s2697_s12   ;;  %p4575_p13 = scmp.ne.s32.totalorder %s4463_s25, 0 }
 0x36e   : > { %p4576_p4 = scmp.ge.s32.totalorder %s2709_s15, 2  ;;  %s2456_s9 = scalar_lea.sflag [#allocation5], %s2455_s30 }
 0x370   : > { %p2541_p5 = pnand %p4576_p4, %p4575_p13 }
 0x372   : > { %p2542_p7 = pneg %p2541_p5 }
 0x374   : > { %2692 = dma.done.wait (%p2542_p7), %s2456_s9, 256  }
 0x375   : > { %2694 = vsyncadd (%p2542_p7), %s2456_s9, 4294967040  ;;  %p16_p8 = scmp.ge.s32.totalorder %s2774_s18, 4   ;;  %s4577_s12 = smov %s2701_s13 }
 0x376   : > { %s4578_s13 = smov %s2705_s14  ;;  %s4579_s14 = smov %s2786_s21 }
 0x377   : > { %s4580_s15 = smov %s2774_s18  ;;  %18 = sbr.rel (!%p16_p8) target bundleno = 5 (0x5), region = 77 }
 0x37c   :  { %2461 = vsyncpa [#allocation4], 1 }
 0x37d   :  { %2463 = vsyncpa [#allocation4 + $0x1], 1 }
 0x37e   :  { %2464 = vsyncpa [#allocation5], 1 }
 0x37f   :  { %2466 = vsyncpa [#allocation5 + $0x1], 1 }

</bundles_post_ra>
